<compile_context>
chip_gen: v7x
topology: tpu7x:2x2x1
jax: 0.10.0
libtpu: 0.0.40
codegen_flags: <defaults>
</compile_context>

<pallas_src>
import functools

import jax
import jax.numpy as jnp
from jax.experimental import pallas as pl
from jax.experimental.pallas import tpu as pltpu

# ----------------------------- model config ---------------------------------
VOCAB = 64
MAX_POS = 32
TYPE_VOCAB = 2
H = 128          # hidden size (stand-in for 768)
NH = 4           # attention heads
DH = H // NH     # head dim
FF = 256         # intermediate size
LAYERS = 2
NUM_CLASSES = 2
CLS_PAD = 128    # classifier head padded to a full lane width
LN_EPS = 1e-12

# Tiling caps: small enough that double-buffered working sets fit v7x's 64 MiB
# VMEM at real BERT sizes, large enough to keep the MXU fed on v5e/v6e.
TM_CAP = 256
TN_CAP = 512
TK_CAP = 1024
VMEM_LIMIT = 48 * 1024 * 1024


def _pick_tile(dim, cap, align):
    """Largest tile <= cap (multiple of `align`) dividing `dim`; else `dim`."""
    if dim <= cap:
        return dim
    t = (cap // align) * align
    while t >= align:
        if dim % t == 0:
            return t
        t -= align
    return dim


def _apply_act(y, activation):
    if activation == "gelu":
        # TODO(synk): HF bert-base-cased uses exact erf GELU; tanh approx used here.
        return jax.nn.gelu(y, approximate=True)
    if activation == "tanh":
        return jnp.tanh(y)
    if activation == "relu":
        return jnp.maximum(y, 0.0)
    return y


def _ln_rows(y, gamma, beta):
    mean = jnp.mean(y, axis=-1, keepdims=True)
    var = jnp.mean((y - mean) ** 2, axis=-1, keepdims=True)
    inv = jax.lax.rsqrt(var + LN_EPS)
    return (y - mean) * inv * gamma + beta


# ----------------------- fused matmul + bias + act ---------------------------
def _dense_kernel_1k(x_ref, w_ref, b_ref, o_ref, *, activation):
    # Single K step: no accumulator scratch, one pass over the output tile.
    y = jnp.dot(x_ref[...], w_ref[...], preferred_element_type=jnp.float32)
    y = _apply_act(y + b_ref[...], activation)
    o_ref[...] = y.astype(o_ref.dtype)


def _dense_kernel_nk(x_ref, w_ref, b_ref, o_ref, acc_ref, *, activation):
    @pl.when(pl.program_id(2) == 0)
    def _():
        acc_ref[...] = jnp.zeros_like(acc_ref)

    acc_ref[...] += jnp.dot(x_ref[...], w_ref[...],
                            preferred_element_type=jnp.float32)

    @pl.when(pl.program_id(2) == pl.num_programs(2) - 1)
    def _():
        y = _apply_act(acc_ref[...] + b_ref[...], activation)
        o_ref[...] = y.astype(o_ref.dtype)


def dense(x, w, b, activation="none", out_dtype=jnp.bfloat16):
    """act(x @ w + b). x: (M, K) bf16, w: (K, N) bf16, b: (N,) f32."""
    M, K = x.shape
    K2, N = w.shape
    assert K == K2
    tm = _pick_tile(M, TM_CAP, 16)
    tn = _pick_tile(N, TN_CAP, 128)
    tk = _pick_tile(K, TK_CAP, 128)
    b2 = b.reshape(1, N).astype(jnp.float32)
    nk = K // tk

    if nk == 1:
        kernel = functools.partial(_dense_kernel_1k, activation=activation)
        grid = (M // tm, N // tn)
        in_specs = [
            pl.BlockSpec((tm, K), lambda i, j: (i, 0)),
            pl.BlockSpec((K, tn), lambda i, j: (0, j)),
            pl.BlockSpec((1, tn), lambda i, j: (0, j)),
        ]
        out_spec = pl.BlockSpec((tm, tn), lambda i, j: (i, j))
        scratch = ()
        dims = ("parallel", "parallel")
    else:
        kernel = functools.partial(_dense_kernel_nk, activation=activation)
        grid = (M // tm, N // tn, nk)
        in_specs = [
            pl.BlockSpec((tm, tk), lambda i, j, k: (i, k)),
            pl.BlockSpec((tk, tn), lambda i, j, k: (k, j)),
            pl.BlockSpec((1, tn), lambda i, j, k: (0, j)),
        ]
        out_spec = pl.BlockSpec((tm, tn), lambda i, j, k: (i, j))
        scratch = (pltpu.VMEM((tm, tn), jnp.float32),)
        dims = ("parallel", "parallel", "arbitrary")

    return pl.pallas_call(
        kernel,
        out_shape=jax.ShapeDtypeStruct((M, N), out_dtype),
        grid_spec=pltpu.PrefetchScalarGridSpec(
            num_scalar_prefetch=0, grid=grid,
            in_specs=in_specs, out_specs=out_spec, scratch_shapes=scratch),
        compiler_params=pltpu.CompilerParams(
            dimension_semantics=dims, vmem_limit_bytes=VMEM_LIMIT),
    )(x, w, b2)


# -------------- fused matmul + bias + residual-add + LayerNorm ---------------
def _dense_res_ln_kernel_1k(x_ref, w_ref, b_ref, r_ref, g_ref, bb_ref, o_ref):
    y = jnp.dot(x_ref[...], w_ref[...], preferred_element_type=jnp.float32)
    y = y + b_ref[...] + r_ref[...].astype(jnp.float32)
    o_ref[...] = _ln_rows(y, g_ref[...], bb_ref[...]).astype(o_ref.dtype)


def _dense_res_ln_kernel_nk(x_ref, w_ref, b_ref, r_ref, g_ref, bb_ref, o_ref,
                            acc_ref):
    @pl.when(pl.program_id(1) == 0)
    def _():
        acc_ref[...] = jnp.zeros_like(acc_ref)

    acc_ref[...] += jnp.dot(x_ref[...], w_ref[...],
                            preferred_element_type=jnp.float32)

    @pl.when(pl.program_id(1) == pl.num_programs(1) - 1)
    def _():
        y = acc_ref[...] + b_ref[...] + r_ref[...].astype(jnp.float32)
        o_ref[...] = _ln_rows(y, g_ref[...], bb_ref[...]).astype(o_ref.dtype)


def dense_residual_ln(x, w, b, residual, gamma, beta, out_dtype=jnp.bfloat16):
    """LayerNorm(x @ w + b + residual). Output tile is full N (needed for LN)."""
    M, K = x.shape
    K2, N = w.shape
    assert K == K2 and residual.shape == (M, N)
    tm = _pick_tile(M, TM_CAP, 16)
    tk = _pick_tile(K, TK_CAP, 128)
    nk = K // tk
    b2 = b.reshape(1, N).astype(jnp.float32)
    g2 = gamma.reshape(1, N).astype(jnp.float32)
    be2 = beta.reshape(1, N).astype(jnp.float32)

    if nk == 1:
        kernel = _dense_res_ln_kernel_1k
        grid = (M // tm,)
        in_specs = [
            pl.BlockSpec((tm, K), lambda i: (i, 0)),
            pl.BlockSpec((K, N), lambda i: (0, 0)),
            pl.BlockSpec((1, N), lambda i: (0, 0)),
            pl.BlockSpec((tm, N), lambda i: (i, 0)),
            pl.BlockSpec((1, N), lambda i: (0, 0)),
            pl.BlockSpec((1, N), lambda i: (0, 0)),
        ]
        out_spec = pl.BlockSpec((tm, N), lambda i: (i, 0))
        scratch = ()
        dims = ("parallel",)
    else:
        kernel = _dense_res_ln_kernel_nk
        grid = (M // tm, nk)
        in_specs = [
            pl.BlockSpec((tm, tk), lambda i, k: (i, k)),
            pl.BlockSpec((tk, N), lambda i, k: (k, 0)),
            pl.BlockSpec((1, N), lambda i, k: (0, 0)),
            pl.BlockSpec((tm, N), lambda i, k: (i, 0)),
            pl.BlockSpec((1, N), lambda i, k: (0, 0)),
            pl.BlockSpec((1, N), lambda i, k: (0, 0)),
        ]
        out_spec = pl.BlockSpec((tm, N), lambda i, k: (i, 0))
        scratch = (pltpu.VMEM((tm, N), jnp.float32),)
        dims = ("parallel", "arbitrary")

    return pl.pallas_call(
        kernel,
        out_shape=jax.ShapeDtypeStruct((M, N), out_dtype),
        grid_spec=pltpu.PrefetchScalarGridSpec(
            num_scalar_prefetch=0, grid=grid,
            in_specs=in_specs, out_specs=out_spec, scratch_shapes=scratch),
        compiler_params=pltpu.CompilerParams(
            dimension_semantics=dims, vmem_limit_bytes=VMEM_LIMIT),
    )(x, w, b2, residual, g2, be2)


# ------------------------------ LayerNorm (rows) ------------------------------
def _layernorm_kernel(x_ref, g_ref, b_ref, o_ref):
    x = x_ref[...].astype(jnp.float32)
    o_ref[...] = _ln_rows(x, g_ref[...], b_ref[...]).astype(o_ref.dtype)


def layernorm(x, gamma, beta, out_dtype=jnp.bfloat16):
    """Row-tiled LayerNorm over the last dim. x: (M, H)."""
    M, Hd = x.shape
    tm = _pick_tile(M, 512, 16)
    return pl.pallas_call(
        _layernorm_kernel,
        out_shape=jax.ShapeDtypeStruct((M, Hd), out_dtype),
        grid_spec=pltpu.PrefetchScalarGridSpec(
            num_scalar_prefetch=0,
            grid=(M // tm,),
            in_specs=[
                pl.BlockSpec((tm, Hd), lambda i: (i, 0)),
                pl.BlockSpec((1, Hd), lambda i: (0, 0)),
                pl.BlockSpec((1, Hd), lambda i: (0, 0)),
            ],
            out_specs=pl.BlockSpec((tm, Hd), lambda i: (i, 0)),
        ),
        compiler_params=pltpu.CompilerParams(dimension_semantics=("parallel",)),
    )(x, gamma.reshape(1, Hd).astype(jnp.float32),
      beta.reshape(1, Hd).astype(jnp.float32))


# ---------------------------- attention kernel -------------------------------
def _attention_kernel(qkv_ref, m_ref, o_ref, *, num_heads, head_dim, hidden,
                      scale):
    qkv = qkv_ref[...]                       # (S, 3H) bf16 lane-dense slab
    bias = m_ref[0]                          # (1, S) f32 additive key mask
    ctx_heads = []
    for h in range(num_heads):               # all heads in one kernel invocation
        lo = h * head_dim
        q = qkv[:, lo:lo + head_dim]
        k = qkv[:, hidden + lo:hidden + lo + head_dim]
        v = qkv[:, 2 * hidden + lo:2 * hidden + lo + head_dim]
        # contract on the last dims (no explicit K transpose materialized)
        s = jax.lax.dot_general(q, k, (((1,), (1,)), ((), ())),
                                preferred_element_type=jnp.float32)
        s = s * scale + bias                  # (S, S) f32
        s_max = jnp.max(s, axis=-1, keepdims=True)
        p = jnp.exp(s - s_max)
        p = p * pl.reciprocal(jnp.sum(p, axis=-1, keepdims=True), approx=True)
        ctx_heads.append(jnp.dot(p.astype(qkv.dtype), v,
                                 preferred_element_type=jnp.float32))
    # single lane-dense (S, H) store
    o_ref[...] = jnp.concatenate(ctx_heads, axis=-1).astype(o_ref.dtype)


def attention(qkv, mask_bias, *, batch, seq):
    """qkv: (B*S, 3H) bf16 slab; mask_bias: (B, 1, S) f32 -> (B*S, H) bf16."""
    kernel = functools.partial(_attention_kernel, num_heads=NH, head_dim=DH,
                               hidden=H, scale=1.0 / (DH ** 0.5))
    return pl.pallas_call(
        kernel,
        out_shape=jax.ShapeDtypeStruct((batch * seq, H), jnp.bfloat16),
        grid_spec=pltpu.PrefetchScalarGridSpec(
            num_scalar_prefetch=0,
            grid=(batch,),
            in_specs=[
                pl.BlockSpec((seq, 3 * H), lambda b: (b, 0)),
                pl.BlockSpec((1, 1, seq), lambda b: (b, 0, 0)),
            ],
            out_specs=pl.BlockSpec((seq, H), lambda b: (b, 0)),
        ),
        compiler_params=pltpu.CompilerParams(dimension_semantics=("parallel",)),
    )(qkv, mask_bias)


# ----------------------- fused pooler + classifier head ----------------------
def _pool_cls_kernel(cls_ref, pw_ref, pb_ref, cw_ref, cb_ref, o_ref):
    pooled = jnp.tanh(
        jnp.dot(cls_ref[...], pw_ref[...], preferred_element_type=jnp.float32)
        + pb_ref[...])
    logits = jnp.dot(pooled, cw_ref[...],
                     preferred_element_type=jnp.float32) + cb_ref[...]
    o_ref[...] = jnp.maximum(logits, 0.0)     # ReLU


def pooler_classifier(cls, pool_w, pool_b, cls_w_pad, cls_b_pad):
    """cls: (B, H) f32 -> relu(tanh(cls@pool_w+pool_b) @ cls_w_pad + cls_b_pad)."""
    B, Hd = cls.shape
    return pl.pallas_call(
        _pool_cls_kernel,
        out_shape=jax.ShapeDtypeStruct((B, CLS_PAD), jnp.float32),
        grid_spec=pltpu.PrefetchScalarGridSpec(
            num_scalar_prefetch=0,
            grid=(1,),
            in_specs=[
                pl.BlockSpec((B, Hd), lambda i: (0, 0)),
                pl.BlockSpec((Hd, Hd), lambda i: (0, 0)),
                pl.BlockSpec((1, Hd), lambda i: (0, 0)),
                pl.BlockSpec((Hd, CLS_PAD), lambda i: (0, 0)),
                pl.BlockSpec((1, CLS_PAD), lambda i: (0, 0)),
            ],
            out_specs=pl.BlockSpec((B, CLS_PAD), lambda i: (0, 0)),
        ),
    )(cls, pool_w, pool_b.reshape(1, Hd), cls_w_pad, cls_b_pad.reshape(1, CLS_PAD))


# ------------------------- parameter initialization --------------------------
def init_params(key):
    def nrm(k, shape, scale=0.02):
        return scale * jax.random.normal(k, shape, dtype=jnp.float32)

    keys = iter(jax.random.split(key, 16 + LAYERS * 16))
    cls_w = nrm(next(keys), (H, NUM_CLASSES))
    cls_w_pad = jnp.zeros((H, CLS_PAD), jnp.float32).at[:, :NUM_CLASSES].set(cls_w)
    p = {
        "word_emb": nrm(next(keys), (VOCAB, H)),
        "pos_emb": nrm(next(keys), (MAX_POS, H)),
        "type_emb": nrm(next(keys), (TYPE_VOCAB, H)),
        "emb_ln_g": jnp.ones((H,), jnp.float32),
        "emb_ln_b": jnp.zeros((H,), jnp.float32),
        "pool_w": nrm(next(keys), (H, H)),              # tiny head kept in f32
        "pool_b": jnp.zeros((H,), jnp.float32),
        "cls_w_pad": cls_w_pad,
        "cls_b_pad": jnp.zeros((CLS_PAD,), jnp.float32),
        "layers": [],
    }
    for _ in range(LAYERS):
        qkv_w = jnp.concatenate(
            [nrm(next(keys), (H, H)), nrm(next(keys), (H, H)),
             nrm(next(keys), (H, H))], axis=1)           # fused (H, 3H)
        lp = {
            "qkv_w": qkv_w.astype(jnp.bfloat16),
            "qkv_b": jnp.zeros((3 * H,), jnp.float32),
            "o_w": nrm(next(keys), (H, H)).astype(jnp.bfloat16),
            "o_b": jnp.zeros((H,), jnp.float32),
            "ln1_g": jnp.ones((H,), jnp.float32),
            "ln1_b": jnp.zeros((H,), jnp.float32),
            "ff1_w": nrm(next(keys), (H, FF)).astype(jnp.bfloat16),
            "ff1_b": jnp.zeros((FF,), jnp.float32),
            "ff2_w": nrm(next(keys), (FF, H)).astype(jnp.bfloat16),
            "ff2_b": jnp.zeros((H,), jnp.float32),
            "ln2_g": jnp.ones((H,), jnp.float32),
            "ln2_b": jnp.zeros((H,), jnp.float32),
        }
        p["layers"].append(lp)
    return p


# --------------------------------- forward -----------------------------------
def bert_classifier_forward(params, input_ids, mask):
    B, S = input_ids.shape

    # Embeddings (gather is glue in plain JAX) + row-tiled LayerNorm kernel.
    word = jnp.take(params["word_emb"], input_ids, axis=0)          # (B, S, H)
    pos = params["pos_emb"][:S][None, :, :]                          # (1, S, H)
    typ = params["type_emb"][0][None, None, :]                       # (1, 1, H)
    emb = (word + pos + typ).reshape(B * S, H)
    h = layernorm(emb, params["emb_ln_g"], params["emb_ln_b"])       # bf16 (B*S, H)

    # Additive attention-mask bias (kept f32; scores accumulate in f32).
    mask_bias = ((1.0 - mask.astype(jnp.float32)) * -1e9).reshape(B, 1, S)

    for lp in params["layers"]:
        x2 = h                                                       # bf16 (B*S, H)
        # Fused QKV projection: one pallas_call, one read of the activation slab.
        qkv = dense(x2, lp["qkv_w"], lp["qkv_b"])                    # (B*S, 3H)
        # All heads per batch in one kernel; lane-dense (S, H) context output.
        ctx = attention(qkv, mask_bias, batch=B, seq=S)              # (B*S, H)
        # Output projection + residual + LayerNorm fused in one kernel epilogue.
        h1 = dense_residual_ln(ctx, lp["o_w"], lp["o_b"], x2,
                               lp["ln1_g"], lp["ln1_b"])
        ff = dense(h1, lp["ff1_w"], lp["ff1_b"], activation="gelu")  # (B*S, FF)
        h = dense_residual_ln(ff, lp["ff2_w"], lp["ff2_b"], h1,
                              lp["ln2_g"], lp["ln2_b"])

    # Pooler (tanh on [CLS]) + dropout + Linear(H,2) + ReLU, fused in one kernel.
    cls = h.reshape(B, S, H)[:, 0, :].astype(jnp.float32)            # (B, H)
    # Dropout: identity at inference.
    # TODO(synk): training-mode dropout (p=0.5) would use pltpu.prng_seed/prng_random_bits.
    logits_pad = pooler_classifier(cls, params["pool_w"], params["pool_b"],
                                   params["cls_w_pad"], params["cls_b_pad"])
    return logits_pad[:, :NUM_CLASSES]                               # (B, 2)


# ----------------------------------- main ------------------------------------
if __name__ == "__main__":
    key = jax.random.PRNGKey(0)
    pkey, ikey = jax.random.split(key)
    params = init_params(pkey)

    B, S = 2, 16
    input_ids = jax.random.randint(ikey, (B, S), 0, VOCAB, dtype=jnp.int32)
    mask = jnp.ones((B, S), dtype=jnp.int32).at[1, S - 4:].set(0)

    fwd = jax.jit(bert_classifier_forward)
    out = fwd(params, input_ids, mask)
    out = jax.block_until_ready(out)
    assert out.shape == (B, NUM_CLASSES)
    assert bool(jnp.all(out >= 0.0))  # ReLU output
    print("KERNEL_OK")
</pallas_src>

<mosaic_0001>
module attributes {stable_mosaic.version = 11 : i64} {
  func.func @_layernorm_kernel(%arg0: i32, %arg1: memref<32x128xf32, #tpu.memory_space<vmem>>, %arg2: memref<1x128xf32, #tpu.memory_space<vmem>>, %arg3: memref<1x128xf32, #tpu.memory_space<vmem>>, %arg4: memref<32x128xbf16, #tpu.memory_space<vmem>>) attributes {dimension_semantics = [#tpu.dimension_semantics<parallel>], iteration_bounds = array<i64: 1>, scalar_prefetch = 0 : i64, scratch_operands = 0 : i64, tpu.core_type = #tpu.core_type<tc>, window_params = [{transform_indices = @transform_0, window_bounds = array<i64: 32, 128>}, {pipeline_mode = #tpu.pipeline_mode<synchronous>, transform_indices = @transform_1, window_bounds = array<i64: 1, 128>}, {pipeline_mode = #tpu.pipeline_mode<synchronous>, transform_indices = @transform_2, window_bounds = array<i64: 1, 128>}, {transform_indices = @transform_3, window_bounds = array<i64: 32, 128>}]} {
    %c0 = arith.constant 0 : index
    %c0_0 = arith.constant 0 : index
    %0 = vector.load %arg1[%c0, %c0_0] : memref<32x128xf32, #tpu.memory_space<vmem>>, vector<32x128xf32>
    %c0_1 = arith.constant 0 : index
    %c0_2 = arith.constant 0 : index
    %1 = vector.load %arg2[%c0_1, %c0_2] : memref<1x128xf32, #tpu.memory_space<vmem>>, vector<1x128xf32>
    %c0_3 = arith.constant 0 : index
    %c0_4 = arith.constant 0 : index
    %2 = vector.load %arg3[%c0_3, %c0_4] : memref<1x128xf32, #tpu.memory_space<vmem>>, vector<1x128xf32>
    %cst = arith.constant dense<0.000000e+00> : vector<32xf32>
    %3 = vector.multi_reduction <add>, %0, %cst [1] : vector<32x128xf32> to vector<32xf32>
    %4 = vector.shape_cast %3 : vector<32xf32> to vector<32x1xf32>
    %cst_5 = arith.constant 1.280000e+02 : f32
    %5 = vector.broadcast %cst_5 : f32 to vector<32x1xf32>
    %6 = arith.divf %4, %5 : vector<32x1xf32>
    %7 = vector.broadcast %6 : vector<32x1xf32> to vector<32x128xf32>
    %8 = arith.subf %0, %7 : vector<32x128xf32>
    %9 = arith.mulf %8, %8 : vector<32x128xf32>
    %cst_6 = arith.constant dense<0.000000e+00> : vector<32xf32>
    %10 = vector.multi_reduction <add>, %9, %cst_6 [1] : vector<32x128xf32> to vector<32xf32>
    %11 = vector.shape_cast %10 : vector<32xf32> to vector<32x1xf32>
    %cst_7 = arith.constant 1.280000e+02 : f32
    %12 = vector.broadcast %cst_7 : f32 to vector<32x1xf32>
    %13 = arith.divf %11, %12 : vector<32x1xf32>
    %cst_8 = arith.constant 9.99999996E-13 : f32
    %14 = vector.broadcast %cst_8 : f32 to vector<32x1xf32>
    %15 = arith.addf %13, %14 : vector<32x1xf32>
    %16 = math.rsqrt %15 : vector<32x1xf32>
    %17 = vector.broadcast %6 : vector<32x1xf32> to vector<32x128xf32>
    %18 = arith.subf %0, %17 : vector<32x128xf32>
    %19 = vector.broadcast %16 : vector<32x1xf32> to vector<32x128xf32>
    %20 = arith.mulf %18, %19 : vector<32x128xf32>
    %21 = vector.broadcast %1 : vector<1x128xf32> to vector<32x128xf32>
    %22 = arith.mulf %20, %21 : vector<32x128xf32>
    %23 = vector.broadcast %2 : vector<1x128xf32> to vector<32x128xf32>
    %24 = arith.addf %22, %23 : vector<32x128xf32>
    %25 = arith.truncf %24 : vector<32x128xf32> to vector<32x128xbf16>
    %c0_9 = arith.constant 0 : index
    %c0_10 = arith.constant 0 : index
    %26 = vector.load %arg4[%c0_9, %c0_10] : memref<32x128xbf16, #tpu.memory_space<vmem>>, vector<32x128xbf16>
    tpu.vector_store %arg4[%c0_9, %c0_10], %25 {strides = array<i32>} : memref<32x128xbf16, #tpu.memory_space<vmem>>, vector<32x128xbf16>,
    return
  }
  func.func @transform_0(%arg0: i32) -> (i32, i32) {
    %c0_i32 = arith.constant 0 : i32
    %c0_i32_0 = arith.constant 0 : i32
    return %arg0, %c0_i32 : i32, i32
  }
  func.func @transform_1(%arg0: i32) -> (i32, i32) {
    %c0_i32 = arith.constant 0 : i32
    %c0_i32_0 = arith.constant 0 : i32
    %c0_i32_1 = arith.constant 0 : i32
    return %c0_i32, %c0_i32_0 : i32, i32
  }
  func.func @transform_2(%arg0: i32) -> (i32, i32) {
    %c0_i32 = arith.constant 0 : i32
    %c0_i32_0 = arith.constant 0 : i32
    %c0_i32_1 = arith.constant 0 : i32
    return %c0_i32, %c0_i32_0 : i32, i32
  }
  func.func @transform_3(%arg0: i32) -> (i32, i32) {
    %c0_i32 = arith.constant 0 : i32
    %c0_i32_0 = arith.constant 0 : i32
    return %arg0, %c0_i32 : i32, i32
  }
}

module attributes {stable_mosaic.version = 11 : i64} {
  func.func @_dense_kernel_1k(%arg0: i32, %arg1: i32, %arg2: memref<32x128xbf16, #tpu.memory_space<vmem>>, %arg3: memref<128x384xbf16, #tpu.memory_space<vmem>>, %arg4: memref<1x384xf32, #tpu.memory_space<vmem>>, %arg5: memref<32x384xbf16, #tpu.memory_space<vmem>>) attributes {dimension_semantics = [#tpu.dimension_semantics<parallel>, #tpu.dimension_semantics<parallel>], iteration_bounds = array<i64: 1, 1>, scalar_prefetch = 0 : i64, scratch_operands = 0 : i64, tpu.core_type = #tpu.core_type<tc>, window_params = [{transform_indices = @transform_0, window_bounds = array<i64: 32, 128>}, {transform_indices = @transform_1, window_bounds = array<i64: 128, 384>}, {transform_indices = @transform_2, window_bounds = array<i64: 1, 384>}, {transform_indices = @transform_3, window_bounds = array<i64: 32, 384>}]} {
    %c0 = arith.constant 0 : index
    %c0_0 = arith.constant 0 : index
    %0 = vector.load %arg2[%c0, %c0_0] : memref<32x128xbf16, #tpu.memory_space<vmem>>, vector<32x128xbf16>
    %c0_1 = arith.constant 0 : index
    %c0_2 = arith.constant 0 : index
    %1 = vector.load %arg3[%c0_1, %c0_2] : memref<128x384xbf16, #tpu.memory_space<vmem>>, vector<128x384xbf16>
    %cst = arith.constant dense<0.000000e+00> : vector<32x384xf32>
    %2 = tpu.matmul %0, %1, %cst {dimension_numbers = #tpu.dot_dimension_numbers<[1], [0], [0], [1], [0, 0, 1, 1], [], []>} : vector<32x128xbf16>, vector<128x384xbf16>, vector<32x384xf32> -> vector<32x384xf32>
    %c0_3 = arith.constant 0 : index
    %c0_4 = arith.constant 0 : index
    %3 = vector.load %arg4[%c0_3, %c0_4] : memref<1x384xf32, #tpu.memory_space<vmem>>, vector<1x384xf32>
    %4 = vector.broadcast %3 : vector<1x384xf32> to vector<32x384xf32>
    %5 = arith.addf %2, %4 : vector<32x384xf32>
    %6 = arith.truncf %5 : vector<32x384xf32> to vector<32x384xbf16>
    %c0_5 = arith.constant 0 : index
    %c0_6 = arith.constant 0 : index
    %7 = vector.load %arg5[%c0_5, %c0_6] : memref<32x384xbf16, #tpu.memory_space<vmem>>, vector<32x384xbf16>
    tpu.vector_store %arg5[%c0_5, %c0_6], %6 {strides = array<i32>} : memref<32x384xbf16, #tpu.memory_space<vmem>>, vector<32x384xbf16>,
    return
  }
  func.func @transform_0(%arg0: i32, %arg1: i32) -> (i32, i32) {
    %c0_i32 = arith.constant 0 : i32
    %c0_i32_0 = arith.constant 0 : i32
    return %arg0, %c0_i32 : i32, i32
  }
  func.func @transform_1(%arg0: i32, %arg1: i32) -> (i32, i32) {
    %c0_i32 = arith.constant 0 : i32
    %c0_i32_0 = arith.constant 0 : i32
    return %c0_i32, %arg1 : i32, i32
  }
  func.func @transform_2(%arg0: i32, %arg1: i32) -> (i32, i32) {
    %c0_i32 = arith.constant 0 : i32
    %c0_i32_0 = arith.constant 0 : i32
    return %c0_i32, %arg1 : i32, i32
  }
  func.func @transform_3(%arg0: i32, %arg1: i32) -> (i32, i32) {
    %c0_i32 = arith.constant 0 : i32
    return %arg0, %arg1 : i32, i32
  }
}

module attributes {stable_mosaic.version = 11 : i64} {
  func.func @_attention_kernel(%arg0: i32, %arg1: memref<16x384xbf16, #tpu.memory_space<vmem>>, %arg2: memref<1x1x16xf32, #tpu.memory_space<vmem>>, %arg3: memref<16x128xbf16, #tpu.memory_space<vmem>>) attributes {dimension_semantics = [#tpu.dimension_semantics<parallel>], iteration_bounds = array<i64: 2>, scalar_prefetch = 0 : i64, scratch_operands = 0 : i64, tpu.core_type = #tpu.core_type<tc>, window_params = [{transform_indices = @transform_0, window_bounds = array<i64: 16, 384>}, {transform_indices = @transform_1, window_bounds = array<i64: 1, 1, 16>}, {transform_indices = @transform_2, window_bounds = array<i64: 16, 128>}]} {
    %c0 = arith.constant 0 : index
    %c0_0 = arith.constant 0 : index
    %0 = vector.load %arg1[%c0, %c0_0] : memref<16x384xbf16, #tpu.memory_space<vmem>>, vector<16x384xbf16>
    %c0_1 = arith.constant 0 : index
    %c0_2 = arith.constant 0 : index
    %c0_3 = arith.constant 0 : index
    %1 = vector.load %arg2[%c0_1, %c0_2, %c0_3] : memref<1x1x16xf32, #tpu.memory_space<vmem>>, vector<1x1x16xf32>
    %2 = vector.shape_cast %1 : vector<1x1x16xf32> to vector<1x16xf32>
    %3 = vector.extract_strided_slice %0 {offsets = [0, 0], sizes = [16, 32], strides = [1, 1]} : vector<16x384xbf16> to vector<16x32xbf16>
    %4 = vector.extract_strided_slice %0 {offsets = [0, 128], sizes = [16, 32], strides = [1, 1]} : vector<16x384xbf16> to vector<16x32xbf16>
    %5 = vector.extract_strided_slice %0 {offsets = [0, 256], sizes = [16, 32], strides = [1, 1]} : vector<16x384xbf16> to vector<16x32xbf16>
    %cst = arith.constant dense<0.000000e+00> : vector<16x16xf32>
    %6 = tpu.matmul %3, %4, %cst {dimension_numbers = #tpu.dot_dimension_numbers<[1], [1], [0], [0], [0, 0, 1, 0], [], []>} : vector<16x32xbf16>, vector<16x32xbf16>, vector<16x16xf32> -> vector<16x16xf32>
    %cst_4 = arith.constant 0.176776692 : f32
    %7 = vector.broadcast %cst_4 : f32 to vector<16x16xf32>
    %8 = arith.mulf %6, %7 : vector<16x16xf32>
    %9 = vector.broadcast %2 : vector<1x16xf32> to vector<16x16xf32>
    %10 = arith.addf %8, %9 : vector<16x16xf32>
    %cst_5 = arith.constant dense<0xFF800000> : vector<16xf32>
    %11 = vector.multi_reduction <maximumf>, %10, %cst_5 [1] : vector<16x16xf32> to vector<16xf32>
    %12 = vector.shape_cast %11 : vector<16xf32> to vector<16x1xf32>
    %13 = vector.broadcast %12 : vector<16x1xf32> to vector<16x16xf32>
    %14 = arith.subf %10, %13 : vector<16x16xf32>
    %15 = math.exp %14 : vector<16x16xf32>
    %cst_6 = arith.constant dense<0.000000e+00> : vector<16xf32>
    %16 = vector.multi_reduction <add>, %15, %cst_6 [1] : vector<16x16xf32> to vector<16xf32>
    %17 = vector.shape_cast %16 : vector<16xf32> to vector<16x1xf32>
    %18 = tpu.reciprocal %17 {approx = true} : vector<16x1xf32> -> vector<16x1xf32>
    %19 = vector.broadcast %18 : vector<16x1xf32> to vector<16x16xf32>
    %20 = arith.mulf %15, %19 : vector<16x16xf32>
    %21 = arith.truncf %20 : vector<16x16xf32> to vector<16x16xbf16>
    %cst_7 = arith.constant dense<0.000000e+00> : vector<16x32xf32>
    %22 = tpu.matmul %21, %5, %cst_7 {dimension_numbers = #tpu.dot_dimension_numbers<[1], [0], [0], [1], [0, 0, 1, 1], [], []>} : vector<16x16xbf16>, vector<16x32xbf16>, vector<16x32xf32> -> vector<16x32xf32>
    %23 = vector.extract_strided_slice %0 {offsets = [0, 32], sizes = [16, 32], strides = [1, 1]} : vector<16x384xbf16> to vector<16x32xbf16>
    %24 = vector.extract_strided_slice %0 {offsets = [0, 160], sizes = [16, 32], strides = [1, 1]} : vector<16x384xbf16> to vector<16x32xbf16>
    %25 = vector.extract_strided_slice %0 {offsets = [0, 288], sizes = [16, 32], strides = [1, 1]} : vector<16x384xbf16> to vector<16x32xbf16>
    %cst_8 = arith.constant dense<0.000000e+00> : vector<16x16xf32>
    %26 = tpu.matmul %23, %24, %cst_8 {dimension_numbers = #tpu.dot_dimension_numbers<[1], [1], [0], [0], [0, 0, 1, 0], [], []>} : vector<16x32xbf16>, vector<16x32xbf16>, vector<16x16xf32> -> vector<16x16xf32>
    %cst_9 = arith.constant 0.176776692 : f32
    %27 = vector.broadcast %cst_9 : f32 to vector<16x16xf32>
    %28 = arith.mulf %26, %27 : vector<16x16xf32>
    %29 = vector.broadcast %2 : vector<1x16xf32> to vector<16x16xf32>
    %30 = arith.addf %28, %29 : vector<16x16xf32>
    %cst_10 = arith.constant dense<0xFF800000> : vector<16xf32>
    %31 = vector.multi_reduction <maximumf>, %30, %cst_10 [1] : vector<16x16xf32> to vector<16xf32>
    %32 = vector.shape_cast %31 : vector<16xf32> to vector<16x1xf32>
    %33 = vector.broadcast %32 : vector<16x1xf32> to vector<16x16xf32>
    %34 = arith.subf %30, %33 : vector<16x16xf32>
    %35 = math.exp %34 : vector<16x16xf32>
    %cst_11 = arith.constant dense<0.000000e+00> : vector<16xf32>
    %36 = vector.multi_reduction <add>, %35, %cst_11 [1] : vector<16x16xf32> to vector<16xf32>
    %37 = vector.shape_cast %36 : vector<16xf32> to vector<16x1xf32>
    %38 = tpu.reciprocal %37 {approx = true} : vector<16x1xf32> -> vector<16x1xf32>
    %39 = vector.broadcast %38 : vector<16x1xf32> to vector<16x16xf32>
    %40 = arith.mulf %35, %39 : vector<16x16xf32>
    %41 = arith.truncf %40 : vector<16x16xf32> to vector<16x16xbf16>
    %cst_12 = arith.constant dense<0.000000e+00> : vector<16x32xf32>
    %42 = tpu.matmul %41, %25, %cst_12 {dimension_numbers = #tpu.dot_dimension_numbers<[1], [0], [0], [1], [0, 0, 1, 1], [], []>} : vector<16x16xbf16>, vector<16x32xbf16>, vector<16x32xf32> -> vector<16x32xf32>
    %43 = vector.extract_strided_slice %0 {offsets = [0, 64], sizes = [16, 32], strides = [1, 1]} : vector<16x384xbf16> to vector<16x32xbf16>
    %44 = vector.extract_strided_slice %0 {offsets = [0, 192], sizes = [16, 32], strides = [1, 1]} : vector<16x384xbf16> to vector<16x32xbf16>
    %45 = vector.extract_strided_slice %0 {offsets = [0, 320], sizes = [16, 32], strides = [1, 1]} : vector<16x384xbf16> to vector<16x32xbf16>
    %cst_13 = arith.constant dense<0.000000e+00> : vector<16x16xf32>
    %46 = tpu.matmul %43, %44, %cst_13 {dimension_numbers = #tpu.dot_dimension_numbers<[1], [1], [0], [0], [0, 0, 1, 0], [], []>} : vector<16x32xbf16>, vector<16x32xbf16>, vector<16x16xf32> -> vector<16x16xf32>
    %cst_14 = arith.constant 0.176776692 : f32
    %47 = vector.broadcast %cst_14 : f32 to vector<16x16xf32>
    %48 = arith.mulf %46, %47 : vector<16x16xf32>
    %49 = vector.broadcast %2 : vector<1x16xf32> to vector<16x16xf32>
    %50 = arith.addf %48, %49 : vector<16x16xf32>
    %cst_15 = arith.constant dense<0xFF800000> : vector<16xf32>
    %51 = vector.multi_reduction <maximumf>, %50, %cst_15 [1] : vector<16x16xf32> to vector<16xf32>
    %52 = vector.shape_cast %51 : vector<16xf32> to vector<16x1xf32>
    %53 = vector.broadcast %52 : vector<16x1xf32> to vector<16x16xf32>
    %54 = arith.subf %50, %53 : vector<16x16xf32>
    %55 = math.exp %54 : vector<16x16xf32>
    %cst_16 = arith.constant dense<0.000000e+00> : vector<16xf32>
    %56 = vector.multi_reduction <add>, %55, %cst_16 [1] : vector<16x16xf32> to vector<16xf32>
    %57 = vector.shape_cast %56 : vector<16xf32> to vector<16x1xf32>
    %58 = tpu.reciprocal %57 {approx = true} : vector<16x1xf32> -> vector<16x1xf32>
    %59 = vector.broadcast %58 : vector<16x1xf32> to vector<16x16xf32>
    %60 = arith.mulf %55, %59 : vector<16x16xf32>
    %61 = arith.truncf %60 : vector<16x16xf32> to vector<16x16xbf16>
    %cst_17 = arith.constant dense<0.000000e+00> : vector<16x32xf32>
    %62 = tpu.matmul %61, %45, %cst_17 {dimension_numbers = #tpu.dot_dimension_numbers<[1], [0], [0], [1], [0, 0, 1, 1], [], []>} : vector<16x16xbf16>, vector<16x32xbf16>, vector<16x32xf32> -> vector<16x32xf32>
    %63 = vector.extract_strided_slice %0 {offsets = [0, 96], sizes = [16, 32], strides = [1, 1]} : vector<16x384xbf16> to vector<16x32xbf16>
    %64 = vector.extract_strided_slice %0 {offsets = [0, 224], sizes = [16, 32], strides = [1, 1]} : vector<16x384xbf16> to vector<16x32xbf16>
    %65 = vector.extract_strided_slice %0 {offsets = [0, 352], sizes = [16, 32], strides = [1, 1]} : vector<16x384xbf16> to vector<16x32xbf16>
    %cst_18 = arith.constant dense<0.000000e+00> : vector<16x16xf32>
    %66 = tpu.matmul %63, %64, %cst_18 {dimension_numbers = #tpu.dot_dimension_numbers<[1], [1], [0], [0], [0, 0, 1, 0], [], []>} : vector<16x32xbf16>, vector<16x32xbf16>, vector<16x16xf32> -> vector<16x16xf32>
    %cst_19 = arith.constant 0.176776692 : f32
    %67 = vector.broadcast %cst_19 : f32 to vector<16x16xf32>
    %68 = arith.mulf %66, %67 : vector<16x16xf32>
    %69 = vector.broadcast %2 : vector<1x16xf32> to vector<16x16xf32>
    %70 = arith.addf %68, %69 : vector<16x16xf32>
    %cst_20 = arith.constant dense<0xFF800000> : vector<16xf32>
    %71 = vector.multi_reduction <maximumf>, %70, %cst_20 [1] : vector<16x16xf32> to vector<16xf32>
    %72 = vector.shape_cast %71 : vector<16xf32> to vector<16x1xf32>
    %73 = vector.broadcast %72 : vector<16x1xf32> to vector<16x16xf32>
    %74 = arith.subf %70, %73 : vector<16x16xf32>
    %75 = math.exp %74 : vector<16x16xf32>
    %cst_21 = arith.constant dense<0.000000e+00> : vector<16xf32>
    %76 = vector.multi_reduction <add>, %75, %cst_21 [1] : vector<16x16xf32> to vector<16xf32>
    %77 = vector.shape_cast %76 : vector<16xf32> to vector<16x1xf32>
    %78 = tpu.reciprocal %77 {approx = true} : vector<16x1xf32> -> vector<16x1xf32>
    %79 = vector.broadcast %78 : vector<16x1xf32> to vector<16x16xf32>
    %80 = arith.mulf %75, %79 : vector<16x16xf32>
    %81 = arith.truncf %80 : vector<16x16xf32> to vector<16x16xbf16>
    %cst_22 = arith.constant dense<0.000000e+00> : vector<16x32xf32>
    %82 = tpu.matmul %81, %65, %cst_22 {dimension_numbers = #tpu.dot_dimension_numbers<[1], [0], [0], [1], [0, 0, 1, 1], [], []>} : vector<16x16xbf16>, vector<16x32xbf16>, vector<16x32xf32> -> vector<16x32xf32>
    %83 = tpu.concatenate %22, %42, %62, %82 in 1 : vector<16x32xf32>, vector<16x32xf32>, vector<16x32xf32>, vector<16x32xf32> -> vector<16x128xf32>
    %84 = arith.truncf %83 : vector<16x128xf32> to vector<16x128xbf16>
    %c0_23 = arith.constant 0 : index
    %c0_24 = arith.constant 0 : index
    %85 = vector.load %arg3[%c0_23, %c0_24] : memref<16x128xbf16, #tpu.memory_space<vmem>>, vector<16x128xbf16>
    tpu.vector_store %arg3[%c0_23, %c0_24], %84 {strides = array<i32>} : memref<16x128xbf16, #tpu.memory_space<vmem>>, vector<16x128xbf16>,
    return
  }
  func.func @transform_0(%arg0: i32) -> (i32, i32) {
    %c0_i32 = arith.constant 0 : i32
    %c0_i32_0 = arith.constant 0 : i32
    return %arg0, %c0_i32 : i32, i32
  }
  func.func @transform_1(%arg0: i32) -> (i32, i32, i32) {
    %c0_i32 = arith.constant 0 : i32
    %c0_i32_0 = arith.constant 0 : i32
    %c0_i32_1 = arith.constant 0 : i32
    return %arg0, %c0_i32, %c0_i32_0 : i32, i32, i32
  }
  func.func @transform_2(%arg0: i32) -> (i32, i32) {
    %c0_i32 = arith.constant 0 : i32
    %c0_i32_0 = arith.constant 0 : i32
    return %arg0, %c0_i32 : i32, i32
  }
}

module attributes {stable_mosaic.version = 11 : i64} {
  func.func @_dense_res_ln_kernel_1k(%arg0: i32, %arg1: memref<32x128xbf16, #tpu.memory_space<vmem>>, %arg2: memref<128x128xbf16, #tpu.memory_space<vmem>>, %arg3: memref<1x128xf32, #tpu.memory_space<vmem>>, %arg4: memref<32x128xbf16, #tpu.memory_space<vmem>>, %arg5: memref<1x128xf32, #tpu.memory_space<vmem>>, %arg6: memref<1x128xf32, #tpu.memory_space<vmem>>, %arg7: memref<32x128xbf16, #tpu.memory_space<vmem>>) attributes {dimension_semantics = [#tpu.dimension_semantics<parallel>], iteration_bounds = array<i64: 1>, scalar_prefetch = 0 : i64, scratch_operands = 0 : i64, tpu.core_type = #tpu.core_type<tc>, window_params = [{transform_indices = @transform_0, window_bounds = array<i64: 32, 128>}, {pipeline_mode = #tpu.pipeline_mode<synchronous>, transform_indices = @transform_1, window_bounds = array<i64: 128, 128>}, {pipeline_mode = #tpu.pipeline_mode<synchronous>, transform_indices = @transform_2, window_bounds = array<i64: 1, 128>}, {transform_indices = @transform_3, window_bounds = array<i64: 32, 128>}, {pipeline_mode = #tpu.pipeline_mode<synchronous>, transform_indices = @transform_4, window_bounds = array<i64: 1, 128>}, {pipeline_mode = #tpu.pipeline_mode<synchronous>, transform_indices = @transform_5, window_bounds = array<i64: 1, 128>}, {transform_indices = @transform_6, window_bounds = array<i64: 32, 128>}]} {
    %c0 = arith.constant 0 : index
    %c0_0 = arith.constant 0 : index
    %0 = vector.load %arg1[%c0, %c0_0] : memref<32x128xbf16, #tpu.memory_space<vmem>>, vector<32x128xbf16>
    %c0_1 = arith.constant 0 : index
    %c0_2 = arith.constant 0 : index
    %1 = vector.load %arg2[%c0_1, %c0_2] : memref<128x128xbf16, #tpu.memory_space<vmem>>, vector<128x128xbf16>
    %cst = arith.constant dense<0.000000e+00> : vector<32x128xf32>
    %2 = tpu.matmul %0, %1, %cst {dimension_numbers = #tpu.dot_dimension_numbers<[1], [0], [0], [1], [0, 0, 1, 1], [], []>} : vector<32x128xbf16>, vector<128x128xbf16>, vector<32x128xf32> -> vector<32x128xf32>
    %c0_3 = arith.constant 0 : index
    %c0_4 = arith.constant 0 : index
    %3 = vector.load %arg3[%c0_3, %c0_4] : memref<1x128xf32, #tpu.memory_space<vmem>>, vector<1x128xf32>
    %4 = vector.broadcast %3 : vector<1x128xf32> to vector<32x128xf32>
    %5 = arith.addf %2, %4 : vector<32x128xf32>
    %c0_5 = arith.constant 0 : index
    %c0_6 = arith.constant 0 : index
    %6 = vector.load %arg4[%c0_5, %c0_6] : memref<32x128xbf16, #tpu.memory_space<vmem>>, vector<32x128xbf16>
    %7 = arith.extf %6 : vector<32x128xbf16> to vector<32x128xf32>
    %8 = arith.addf %5, %7 : vector<32x128xf32>
    %c0_7 = arith.constant 0 : index
    %c0_8 = arith.constant 0 : index
    %9 = vector.load %arg5[%c0_7, %c0_8] : memref<1x128xf32, #tpu.memory_space<vmem>>, vector<1x128xf32>
    %c0_9 = arith.constant 0 : index
    %c0_10 = arith.constant 0 : index
    %10 = vector.load %arg6[%c0_9, %c0_10] : memref<1x128xf32, #tpu.memory_space<vmem>>, vector<1x128xf32>
    %cst_11 = arith.constant dense<0.000000e+00> : vector<32xf32>
    %11 = vector.multi_reduction <add>, %8, %cst_11 [1] : vector<32x128xf32> to vector<32xf32>
    %12 = vector.shape_cast %11 : vector<32xf32> to vector<32x1xf32>
    %cst_12 = arith.constant 1.280000e+02 : f32
    %13 = vector.broadcast %cst_12 : f32 to vector<32x1xf32>
    %14 = arith.divf %12, %13 : vector<32x1xf32>
    %15 = vector.broadcast %14 : vector<32x1xf32> to vector<32x128xf32>
    %16 = arith.subf %8, %15 : vector<32x128xf32>
    %17 = arith.mulf %16, %16 : vector<32x128xf32>
    %cst_13 = arith.constant dense<0.000000e+00> : vector<32xf32>
    %18 = vector.multi_reduction <add>, %17, %cst_13 [1] : vector<32x128xf32> to vector<32xf32>
    %19 = vector.shape_cast %18 : vector<32xf32> to vector<32x1xf32>
    %cst_14 = arith.constant 1.280000e+02 : f32
    %20 = vector.broadcast %cst_14 : f32 to vector<32x1xf32>
    %21 = arith.divf %19, %20 : vector<32x1xf32>
    %cst_15 = arith.constant 9.99999996E-13 : f32
    %22 = vector.broadcast %cst_15 : f32 to vector<32x1xf32>
    %23 = arith.addf %21, %22 : vector<32x1xf32>
    %24 = math.rsqrt %23 : vector<32x1xf32>
    %25 = vector.broadcast %14 : vector<32x1xf32> to vector<32x128xf32>
    %26 = arith.subf %8, %25 : vector<32x128xf32>
    %27 = vector.broadcast %24 : vector<32x1xf32> to vector<32x128xf32>
    %28 = arith.mulf %26, %27 : vector<32x128xf32>
    %29 = vector.broadcast %9 : vector<1x128xf32> to vector<32x128xf32>
    %30 = arith.mulf %28, %29 : vector<32x128xf32>
    %31 = vector.broadcast %10 : vector<1x128xf32> to vector<32x128xf32>
    %32 = arith.addf %30, %31 : vector<32x128xf32>
    %33 = arith.truncf %32 : vector<32x128xf32> to vector<32x128xbf16>
    %c0_16 = arith.constant 0 : index
    %c0_17 = arith.constant 0 : index
    %34 = vector.load %arg7[%c0_16, %c0_17] : memref<32x128xbf16, #tpu.memory_space<vmem>>, vector<32x128xbf16>
    tpu.vector_store %arg7[%c0_16, %c0_17], %33 {strides = array<i32>} : memref<32x128xbf16, #tpu.memory_space<vmem>>, vector<32x128xbf16>,
    return
  }
  func.func @transform_0(%arg0: i32) -> (i32, i32) {
    %c0_i32 = arith.constant 0 : i32
    %c0_i32_0 = arith.constant 0 : i32
    return %arg0, %c0_i32 : i32, i32
  }
  func.func @transform_1(%arg0: i32) -> (i32, i32) {
    %c0_i32 = arith.constant 0 : i32
    %c0_i32_0 = arith.constant 0 : i32
    %c0_i32_1 = arith.constant 0 : i32
    return %c0_i32, %c0_i32_0 : i32, i32
  }
  func.func @transform_2(%arg0: i32) -> (i32, i32) {
    %c0_i32 = arith.constant 0 : i32
    %c0_i32_0 = arith.constant 0 : i32
    %c0_i32_1 = arith.constant 0 : i32
    return %c0_i32, %c0_i32_0 : i32, i32
  }
  func.func @transform_3(%arg0: i32) -> (i32, i32) {
    %c0_i32 = arith.constant 0 : i32
    %c0_i32_0 = arith.constant 0 : i32
    return %arg0, %c0_i32 : i32, i32
  }
  func.func @transform_4(%arg0: i32) -> (i32, i32) {
    %c0_i32 = arith.constant 0 : i32
    %c0_i32_0 = arith.constant 0 : i32
    %c0_i32_1 = arith.constant 0 : i32
    return %c0_i32, %c0_i32_0 : i32, i32
  }
  func.func @transform_5(%arg0: i32) -> (i32, i32) {
    %c0_i32 = arith.constant 0 : i32
    %c0_i32_0 = arith.constant 0 : i32
    %c0_i32_1 = arith.constant 0 : i32
    return %c0_i32, %c0_i32_0 : i32, i32
  }
  func.func @transform_6(%arg0: i32) -> (i32, i32) {
    %c0_i32 = arith.constant 0 : i32
    %c0_i32_0 = arith.constant 0 : i32
    return %arg0, %c0_i32 : i32, i32
  }
}

module attributes {stable_mosaic.version = 11 : i64} {
  func.func @_dense_kernel_1k(%arg0: i32, %arg1: i32, %arg2: memref<32x128xbf16, #tpu.memory_space<vmem>>, %arg3: memref<128x256xbf16, #tpu.memory_space<vmem>>, %arg4: memref<1x256xf32, #tpu.memory_space<vmem>>, %arg5: memref<32x256xbf16, #tpu.memory_space<vmem>>) attributes {dimension_semantics = [#tpu.dimension_semantics<parallel>, #tpu.dimension_semantics<parallel>], iteration_bounds = array<i64: 1, 1>, scalar_prefetch = 0 : i64, scratch_operands = 0 : i64, tpu.core_type = #tpu.core_type<tc>, window_params = [{transform_indices = @transform_0, window_bounds = array<i64: 32, 128>}, {transform_indices = @transform_1, window_bounds = array<i64: 128, 256>}, {transform_indices = @transform_2, window_bounds = array<i64: 1, 256>}, {transform_indices = @transform_3, window_bounds = array<i64: 32, 256>}]} {
    %c0 = arith.constant 0 : index
    %c0_0 = arith.constant 0 : index
    %0 = vector.load %arg2[%c0, %c0_0] : memref<32x128xbf16, #tpu.memory_space<vmem>>, vector<32x128xbf16>
    %c0_1 = arith.constant 0 : index
    %c0_2 = arith.constant 0 : index
    %1 = vector.load %arg3[%c0_1, %c0_2] : memref<128x256xbf16, #tpu.memory_space<vmem>>, vector<128x256xbf16>
    %cst = arith.constant dense<0.000000e+00> : vector<32x256xf32>
    %2 = tpu.matmul %0, %1, %cst {dimension_numbers = #tpu.dot_dimension_numbers<[1], [0], [0], [1], [0, 0, 1, 1], [], []>} : vector<32x128xbf16>, vector<128x256xbf16>, vector<32x256xf32> -> vector<32x256xf32>
    %c0_3 = arith.constant 0 : index
    %c0_4 = arith.constant 0 : index
    %3 = vector.load %arg4[%c0_3, %c0_4] : memref<1x256xf32, #tpu.memory_space<vmem>>, vector<1x256xf32>
    %4 = vector.broadcast %3 : vector<1x256xf32> to vector<32x256xf32>
    %5 = arith.addf %2, %4 : vector<32x256xf32>
    %6 = arith.mulf %5, %5 : vector<32x256xf32>
    %7 = arith.mulf %5, %6 : vector<32x256xf32>
    %cst_5 = arith.constant 4.471500e-02 : f32
    %8 = vector.broadcast %cst_5 : f32 to vector<32x256xf32>
    %9 = arith.mulf %8, %7 : vector<32x256xf32>
    %10 = arith.addf %5, %9 : vector<32x256xf32>
    %cst_6 = arith.constant 0.797884583 : f32
    %11 = vector.broadcast %cst_6 : f32 to vector<32x256xf32>
    %12 = arith.mulf %11, %10 : vector<32x256xf32>
    %13 = math.tanh %12 : vector<32x256xf32>
    %cst_7 = arith.constant 1.000000e+00 : f32
    %14 = vector.broadcast %cst_7 : f32 to vector<32x256xf32>
    %15 = arith.addf %14, %13 : vector<32x256xf32>
    %cst_8 = arith.constant 5.000000e-01 : f32
    %16 = vector.broadcast %cst_8 : f32 to vector<32x256xf32>
    %17 = arith.mulf %16, %15 : vector<32x256xf32>
    %18 = arith.mulf %5, %17 : vector<32x256xf32>
    %19 = arith.truncf %18 : vector<32x256xf32> to vector<32x256xbf16>
    %c0_9 = arith.constant 0 : index
    %c0_10 = arith.constant 0 : index
    %20 = vector.load %arg5[%c0_9, %c0_10] : memref<32x256xbf16, #tpu.memory_space<vmem>>, vector<32x256xbf16>
    tpu.vector_store %arg5[%c0_9, %c0_10], %19 {strides = array<i32>} : memref<32x256xbf16, #tpu.memory_space<vmem>>, vector<32x256xbf16>,
    return
  }
  func.func @transform_0(%arg0: i32, %arg1: i32) -> (i32, i32) {
    %c0_i32 = arith.constant 0 : i32
    %c0_i32_0 = arith.constant 0 : i32
    return %arg0, %c0_i32 : i32, i32
  }
  func.func @transform_1(%arg0: i32, %arg1: i32) -> (i32, i32) {
    %c0_i32 = arith.constant 0 : i32
    %c0_i32_0 = arith.constant 0 : i32
    return %c0_i32, %arg1 : i32, i32
  }
  func.func @transform_2(%arg0: i32, %arg1: i32) -> (i32, i32) {
    %c0_i32 = arith.constant 0 : i32
    %c0_i32_0 = arith.constant 0 : i32
    return %c0_i32, %arg1 : i32, i32
  }
  func.func @transform_3(%arg0: i32, %arg1: i32) -> (i32, i32) {
    %c0_i32 = arith.constant 0 : i32
    return %arg0, %arg1 : i32, i32
  }
}

module attributes {stable_mosaic.version = 11 : i64} {
  func.func @_dense_res_ln_kernel_1k(%arg0: i32, %arg1: memref<32x256xbf16, #tpu.memory_space<vmem>>, %arg2: memref<256x128xbf16, #tpu.memory_space<vmem>>, %arg3: memref<1x128xf32, #tpu.memory_space<vmem>>, %arg4: memref<32x128xbf16, #tpu.memory_space<vmem>>, %arg5: memref<1x128xf32, #tpu.memory_space<vmem>>, %arg6: memref<1x128xf32, #tpu.memory_space<vmem>>, %arg7: memref<32x128xbf16, #tpu.memory_space<vmem>>) attributes {dimension_semantics = [#tpu.dimension_semantics<parallel>], iteration_bounds = array<i64: 1>, scalar_prefetch = 0 : i64, scratch_operands = 0 : i64, tpu.core_type = #tpu.core_type<tc>, window_params = [{transform_indices = @transform_0, window_bounds = array<i64: 32, 256>}, {pipeline_mode = #tpu.pipeline_mode<synchronous>, transform_indices = @transform_1, window_bounds = array<i64: 256, 128>}, {pipeline_mode = #tpu.pipeline_mode<synchronous>, transform_indices = @transform_2, window_bounds = array<i64: 1, 128>}, {transform_indices = @transform_3, window_bounds = array<i64: 32, 128>}, {pipeline_mode = #tpu.pipeline_mode<synchronous>, transform_indices = @transform_4, window_bounds = array<i64: 1, 128>}, {pipeline_mode = #tpu.pipeline_mode<synchronous>, transform_indices = @transform_5, window_bounds = array<i64: 1, 128>}, {transform_indices = @transform_6, window_bounds = array<i64: 32, 128>}]} {
    %c0 = arith.constant 0 : index
    %c0_0 = arith.constant 0 : index
    %0 = vector.load %arg1[%c0, %c0_0] : memref<32x256xbf16, #tpu.memory_space<vmem>>, vector<32x256xbf16>
    %c0_1 = arith.constant 0 : index
    %c0_2 = arith.constant 0 : index
    %1 = vector.load %arg2[%c0_1, %c0_2] : memref<256x128xbf16, #tpu.memory_space<vmem>>, vector<256x128xbf16>
    %cst = arith.constant dense<0.000000e+00> : vector<32x128xf32>
    %2 = tpu.matmul %0, %1, %cst {dimension_numbers = #tpu.dot_dimension_numbers<[1], [0], [0], [1], [0, 0, 1, 1], [], []>} : vector<32x256xbf16>, vector<256x128xbf16>, vector<32x128xf32> -> vector<32x128xf32>
    %c0_3 = arith.constant 0 : index
    %c0_4 = arith.constant 0 : index
    %3 = vector.load %arg3[%c0_3, %c0_4] : memref<1x128xf32, #tpu.memory_space<vmem>>, vector<1x128xf32>
    %4 = vector.broadcast %3 : vector<1x128xf32> to vector<32x128xf32>
    %5 = arith.addf %2, %4 : vector<32x128xf32>
    %c0_5 = arith.constant 0 : index
    %c0_6 = arith.constant 0 : index
    %6 = vector.load %arg4[%c0_5, %c0_6] : memref<32x128xbf16, #tpu.memory_space<vmem>>, vector<32x128xbf16>
    %7 = arith.extf %6 : vector<32x128xbf16> to vector<32x128xf32>
    %8 = arith.addf %5, %7 : vector<32x128xf32>
    %c0_7 = arith.constant 0 : index
    %c0_8 = arith.constant 0 : index
    %9 = vector.load %arg5[%c0_7, %c0_8] : memref<1x128xf32, #tpu.memory_space<vmem>>, vector<1x128xf32>
    %c0_9 = arith.constant 0 : index
    %c0_10 = arith.constant 0 : index
    %10 = vector.load %arg6[%c0_9, %c0_10] : memref<1x128xf32, #tpu.memory_space<vmem>>, vector<1x128xf32>
    %cst_11 = arith.constant dense<0.000000e+00> : vector<32xf32>
    %11 = vector.multi_reduction <add>, %8, %cst_11 [1] : vector<32x128xf32> to vector<32xf32>
    %12 = vector.shape_cast %11 : vector<32xf32> to vector<32x1xf32>
    %cst_12 = arith.constant 1.280000e+02 : f32
    %13 = vector.broadcast %cst_12 : f32 to vector<32x1xf32>
    %14 = arith.divf %12, %13 : vector<32x1xf32>
    %15 = vector.broadcast %14 : vector<32x1xf32> to vector<32x128xf32>
    %16 = arith.subf %8, %15 : vector<32x128xf32>
    %17 = arith.mulf %16, %16 : vector<32x128xf32>
    %cst_13 = arith.constant dense<0.000000e+00> : vector<32xf32>
    %18 = vector.multi_reduction <add>, %17, %cst_13 [1] : vector<32x128xf32> to vector<32xf32>
    %19 = vector.shape_cast %18 : vector<32xf32> to vector<32x1xf32>
    %cst_14 = arith.constant 1.280000e+02 : f32
    %20 = vector.broadcast %cst_14 : f32 to vector<32x1xf32>
    %21 = arith.divf %19, %20 : vector<32x1xf32>
    %cst_15 = arith.constant 9.99999996E-13 : f32
    %22 = vector.broadcast %cst_15 : f32 to vector<32x1xf32>
    %23 = arith.addf %21, %22 : vector<32x1xf32>
    %24 = math.rsqrt %23 : vector<32x1xf32>
    %25 = vector.broadcast %14 : vector<32x1xf32> to vector<32x128xf32>
    %26 = arith.subf %8, %25 : vector<32x128xf32>
    %27 = vector.broadcast %24 : vector<32x1xf32> to vector<32x128xf32>
    %28 = arith.mulf %26, %27 : vector<32x128xf32>
    %29 = vector.broadcast %9 : vector<1x128xf32> to vector<32x128xf32>
    %30 = arith.mulf %28, %29 : vector<32x128xf32>
    %31 = vector.broadcast %10 : vector<1x128xf32> to vector<32x128xf32>
    %32 = arith.addf %30, %31 : vector<32x128xf32>
    %33 = arith.truncf %32 : vector<32x128xf32> to vector<32x128xbf16>
    %c0_16 = arith.constant 0 : index
    %c0_17 = arith.constant 0 : index
    %34 = vector.load %arg7[%c0_16, %c0_17] : memref<32x128xbf16, #tpu.memory_space<vmem>>, vector<32x128xbf16>
    tpu.vector_store %arg7[%c0_16, %c0_17], %33 {strides = array<i32>} : memref<32x128xbf16, #tpu.memory_space<vmem>>, vector<32x128xbf16>,
    return
  }
  func.func @transform_0(%arg0: i32) -> (i32, i32) {
    %c0_i32 = arith.constant 0 : i32
    %c0_i32_0 = arith.constant 0 : i32
    return %arg0, %c0_i32 : i32, i32
  }
  func.func @transform_1(%arg0: i32) -> (i32, i32) {
    %c0_i32 = arith.constant 0 : i32
    %c0_i32_0 = arith.constant 0 : i32
    %c0_i32_1 = arith.constant 0 : i32
    return %c0_i32, %c0_i32_0 : i32, i32
  }
  func.func @transform_2(%arg0: i32) -> (i32, i32) {
    %c0_i32 = arith.constant 0 : i32
    %c0_i32_0 = arith.constant 0 : i32
    %c0_i32_1 = arith.constant 0 : i32
    return %c0_i32, %c0_i32_0 : i32, i32
  }
  func.func @transform_3(%arg0: i32) -> (i32, i32) {
    %c0_i32 = arith.constant 0 : i32
    %c0_i32_0 = arith.constant 0 : i32
    return %arg0, %c0_i32 : i32, i32
  }
  func.func @transform_4(%arg0: i32) -> (i32, i32) {
    %c0_i32 = arith.constant 0 : i32
    %c0_i32_0 = arith.constant 0 : i32
    %c0_i32_1 = arith.constant 0 : i32
    return %c0_i32, %c0_i32_0 : i32, i32
  }
  func.func @transform_5(%arg0: i32) -> (i32, i32) {
    %c0_i32 = arith.constant 0 : i32
    %c0_i32_0 = arith.constant 0 : i32
    %c0_i32_1 = arith.constant 0 : i32
    return %c0_i32, %c0_i32_0 : i32, i32
  }
  func.func @transform_6(%arg0: i32) -> (i32, i32) {
    %c0_i32 = arith.constant 0 : i32
    %c0_i32_0 = arith.constant 0 : i32
    return %arg0, %c0_i32 : i32, i32
  }
}

module attributes {stable_mosaic.version = 11 : i64} {
  func.func @_pool_cls_kernel(%arg0: i32, %arg1: memref<2x128xf32, #tpu.memory_space<vmem>>, %arg2: memref<128x128xf32, #tpu.memory_space<vmem>>, %arg3: memref<1x128xf32, #tpu.memory_space<vmem>>, %arg4: memref<128x128xf32, #tpu.memory_space<vmem>>, %arg5: memref<1x128xf32, #tpu.memory_space<vmem>>, %arg6: memref<2x128xf32, #tpu.memory_space<vmem>>) attributes {dimension_semantics = [#tpu.dimension_semantics<arbitrary>], iteration_bounds = array<i64: 1>, scalar_prefetch = 0 : i64, scratch_operands = 0 : i64, tpu.core_type = #tpu.core_type<tc>, window_params = [{pipeline_mode = #tpu.pipeline_mode<synchronous>, transform_indices = @transform_0, window_bounds = array<i64: 2, 128>}, {pipeline_mode = #tpu.pipeline_mode<synchronous>, transform_indices = @transform_1, window_bounds = array<i64: 128, 128>}, {pipeline_mode = #tpu.pipeline_mode<synchronous>, transform_indices = @transform_2, window_bounds = array<i64: 1, 128>}, {pipeline_mode = #tpu.pipeline_mode<synchronous>, transform_indices = @transform_3, window_bounds = array<i64: 128, 128>}, {pipeline_mode = #tpu.pipeline_mode<synchronous>, transform_indices = @transform_4, window_bounds = array<i64: 1, 128>}, {pipeline_mode = #tpu.pipeline_mode<synchronous>, transform_indices = @transform_5, window_bounds = array<i64: 2, 128>}]} {
    %c0 = arith.constant 0 : index
    %c0_0 = arith.constant 0 : index
    %0 = vector.load %arg1[%c0, %c0_0] : memref<2x128xf32, #tpu.memory_space<vmem>>, vector<2x128xf32>
    %c0_1 = arith.constant 0 : index
    %c0_2 = arith.constant 0 : index
    %1 = vector.load %arg2[%c0_1, %c0_2] : memref<128x128xf32, #tpu.memory_space<vmem>>, vector<128x128xf32>
    %cst = arith.constant dense<0.000000e+00> : vector<2x128xf32>
    %2 = tpu.matmul %0, %1, %cst {dimension_numbers = #tpu.dot_dimension_numbers<[1], [0], [0], [1], [0, 0, 1, 1], [], []>} : vector<2x128xf32>, vector<128x128xf32>, vector<2x128xf32> -> vector<2x128xf32>
    %c0_3 = arith.constant 0 : index
    %c0_4 = arith.constant 0 : index
    %3 = vector.load %arg3[%c0_3, %c0_4] : memref<1x128xf32, #tpu.memory_space<vmem>>, vector<1x128xf32>
    %4 = vector.broadcast %3 : vector<1x128xf32> to vector<2x128xf32>
    %5 = arith.addf %2, %4 : vector<2x128xf32>
    %6 = math.tanh %5 : vector<2x128xf32>
    %c0_5 = arith.constant 0 : index
    %c0_6 = arith.constant 0 : index
    %7 = vector.load %arg4[%c0_5, %c0_6] : memref<128x128xf32, #tpu.memory_space<vmem>>, vector<128x128xf32>
    %cst_7 = arith.constant dense<0.000000e+00> : vector<2x128xf32>
    %8 = tpu.matmul %6, %7, %cst_7 {dimension_numbers = #tpu.dot_dimension_numbers<[1], [0], [0], [1], [0, 0, 1, 1], [], []>} : vector<2x128xf32>, vector<128x128xf32>, vector<2x128xf32> -> vector<2x128xf32>
    %c0_8 = arith.constant 0 : index
    %c0_9 = arith.constant 0 : index
    %9 = vector.load %arg5[%c0_8, %c0_9] : memref<1x128xf32, #tpu.memory_space<vmem>>, vector<1x128xf32>
    %10 = vector.broadcast %9 : vector<1x128xf32> to vector<2x128xf32>
    %11 = arith.addf %8, %10 : vector<2x128xf32>
    %cst_10 = arith.constant 0.000000e+00 : f32
    %12 = vector.broadcast %cst_10 : f32 to vector<2x128xf32>
    %13 = arith.maximumf %11, %12 : vector<2x128xf32>
    %c0_11 = arith.constant 0 : index
    %c0_12 = arith.constant 0 : index
    %14 = vector.load %arg6[%c0_11, %c0_12] : memref<2x128xf32, #tpu.memory_space<vmem>>, vector<2x128xf32>
    tpu.vector_store %arg6[%c0_11, %c0_12], %13 {strides = array<i32>} : memref<2x128xf32, #tpu.memory_space<vmem>>, vector<2x128xf32>,
    return
  }
  func.func @transform_0(%arg0: i32) -> (i32, i32) {
    %c0_i32 = arith.constant 0 : i32
    %c0_i32_0 = arith.constant 0 : i32
    %c0_i32_1 = arith.constant 0 : i32
    return %c0_i32, %c0_i32_0 : i32, i32
  }
  func.func @transform_1(%arg0: i32) -> (i32, i32) {
    %c0_i32 = arith.constant 0 : i32
    %c0_i32_0 = arith.constant 0 : i32
    %c0_i32_1 = arith.constant 0 : i32
    return %c0_i32, %c0_i32_0 : i32, i32
  }
  func.func @transform_2(%arg0: i32) -> (i32, i32) {
    %c0_i32 = arith.constant 0 : i32
    %c0_i32_0 = arith.constant 0 : i32
    %c0_i32_1 = arith.constant 0 : i32
    return %c0_i32, %c0_i32_0 : i32, i32
  }
  func.func @transform_3(%arg0: i32) -> (i32, i32) {
    %c0_i32 = arith.constant 0 : i32
    %c0_i32_0 = arith.constant 0 : i32
    %c0_i32_1 = arith.constant 0 : i32
    return %c0_i32, %c0_i32_0 : i32, i32
  }
  func.func @transform_4(%arg0: i32) -> (i32, i32) {
    %c0_i32 = arith.constant 0 : i32
    %c0_i32_0 = arith.constant 0 : i32
    %c0_i32_1 = arith.constant 0 : i32
    return %c0_i32, %c0_i32_0 : i32, i32
  }
  func.func @transform_5(%arg0: i32) -> (i32, i32) {
    %c0_i32 = arith.constant 0 : i32
    %c0_i32_0 = arith.constant 0 : i32
    %c0_i32_1 = arith.constant 0 : i32
    return %c0_i32, %c0_i32_0 : i32, i32
  }
}

</mosaic_0001>

<bundles_post_ra>
// kernel: bert_classifier_forward.12
= control target key start
LH: loop header
LB: loop body
LE: loop exit
PB: predicated region body
PF: predicated region fallthrough
CT: control target
= control target key end

     0   :  { %s182_s0 = inlined_call_operand.vmem [shape: f32[32,128], index: 0, kind: input, shape index: {}]   ;;  %s183_s1 = inlined_call_operand.vmem [shape: f32[1,128], index: 1, kind: input, shape index: {}]   ;;  %s184_s2 = inlined_call_operand.vmem [shape: f32[1,128], index: 2, kind: input, shape index: {}]   ;;  %s185_s3 = inlined_call_operand.vmem [shape: bf16[32,128], index: 3, kind: output, shape index: {}]  }
   0x1   :  { %v14_v0 = vld [vmem:[%s182_s0] sm:$0xff]  ;;  %v16_v1 = vld [vmem:[%s182_s0 + $0x10] sm:$0xff]  ;;  %v15_v2 = vld [vmem:[%s182_s0 + $0x8] sm:$0xff] }
   0x2   :  { %20 = vadd.xlane.f32.xlu0 %v14_v0  ;;  %24 = vadd.xlane.f32.xlu1 %v16_v1  ;;  %v17_v3 = vld [vmem:[%s182_s0 + $0x18] sm:$0xff]  ;;  %v109_v34 = vld [vmem:[%s183_s1] ss:$0 sm:$0xff] }
   0x3   :  { %v110_v39 = vld [vmem:[%s184_s2] ss:$0 sm:$0xff] }
   0x6   :  { %22 = vadd.xlane.f32.xlu0 %v15_v2  ;;  %26 = vadd.xlane.f32.xlu1 %v17_v3 }
  0x8f   :  { %v21_v4 = vpop.xlane.xlu0 %20  ;;  %v25_v5 = vpop.xlane.xlu1 %24 }
  0x90   :  { %v29_v6 = vmul.f32 0.0078125, %v21_v4  ;;  %v31_v7 = vmul.f32 0.0078125, %v25_v5 }
  0x92   :  { %v33_v8 = vsub.f32 %v14_v0, %v29_v6  ;;  %v35_v9 = vsub.f32 %v16_v1, %v31_v7 }
  0x93   :  { %v23_v10 = vpop.xlane.xlu0 %22  ;;  %v27_v11 = vpop.xlane.xlu1 %26 }
  0x94   :  { %v30_v12 = vmul.f32 0.0078125, %v23_v10  ;;  %v37_v13 = vmul.f32 %v33_v8, %v33_v8  ;;  %v32_v14 = vmul.f32 0.0078125, %v27_v11  ;;  %v39_v17 = vmul.f32 %v35_v9, %v35_v9 }
  0x96   :  { %v34_v15 = vsub.f32 %v15_v2, %v30_v12  ;;  %41 = vadd.xlane.f32.xlu0 %v37_v13  ;;  %v36_v16 = vsub.f32 %v17_v3, %v32_v14 }
  0x98   :  { %v38_v18 = vmul.f32 %v34_v15, %v34_v15  ;;  %v40_v19 = vmul.f32 %v36_v16, %v36_v16 }
  0x9a   :  { %45 = vadd.xlane.f32.xlu0 %v39_v17  ;;  %43 = vadd.xlane.f32.xlu1 %v38_v18 }
  0x9e   :  { %47 = vadd.xlane.f32.xlu1 %v40_v19 }
 0x123   :  { %v42_v20 = vpop.xlane.xlu0 %41 }
 0x124   :  { %v49_v21 = vmul.f32 0.0078125, %v42_v20 }
 0x126   :  { %v53_v22 = vadd.f32 1e-12, %v49_v21 }
 0x127   :  { %v44_v23 = vpop.xlane.xlu1 %43  ;;  %v46_v24 = vpop.xlane.xlu0 %45 }
 0x128   :  { %130 = vrsqrt.f32 %v53_v22  ;;  %v50_v25 = vmul.f32 0.0078125, %v44_v23  ;;  %v51_v26 = vmul.f32 0.0078125, %v46_v24 }
 0x12a   :  { %v54_v27 = vadd.f32 1e-12, %v50_v25  ;;  %v55_v28 = vadd.f32 1e-12, %v51_v26 }
 0x12b   :  { %v48_v29 = vpop.xlane.xlu1 %47 }
 0x12c   :  { %132 = vrsqrt.f32 %v54_v27  ;;  %v52_v30 = vmul.f32 0.0078125, %v48_v29 }
 0x12d   :  { %134 = vrsqrt.f32 %v55_v28 }
 0x12e   :  { %v56_v31 = vadd.f32 1e-12, %v52_v30 }
 0x130   :  { %136 = vrsqrt.f32 %v56_v31 }
 0x132   :  { %v131_v32 = vpop.eup %130 }
 0x133   :  { %v61_v33 = vmul.f32 %v131_v32, %v33_v8 }
 0x135   :  { %v71_v37 = vmul.f32 %v109_v34, %v61_v33 }
 0x136   :  { %v133_v35 = vpop.eup %132 }
 0x137   :  { %v135_v36 = vpop.eup %134  ;;  %v62_v38 = vmul.f32 %v133_v35, %v34_v15  ;;  %v81_v43 = vadd.f32 %v110_v39, %v71_v37 }
 0x138   :  { %v63_v40 = vmul.f32 %v135_v36, %v35_v9 }
 0x139   :  { %v72_v41 = vmul.f32 %v109_v34, %v62_v38 }
 0x13a   :  { %v137_v42 = vpop.eup %136  ;;  %v73_v45 = vmul.f32 %v109_v34, %v63_v40 }
 0x13b   :  { %v82_v44 = vadd.f32 %v110_v39, %v72_v41  ;;  %v64_v46 = vmul.f32 %v137_v42, %v36_v16 }
 0x13c   :  { %v83_v49 = vadd.f32 %v110_v39, %v73_v45 }
 0x13d   :  { %v122_v47 = vpack.c.bf16 %v82_v44, %v81_v43  ;;  %v74_v48 = vmul.f32 %v109_v34, %v64_v46 }
 0x13f   :  { %123 = vst [vmem:[%s185_s3] sm:$0xff] %v122_v47   ;;  %v84_v50 = vadd.f32 %v110_v39, %v74_v48 }
 0x141   :  { %v127_v51 = vpack.c.bf16 %v84_v50, %v83_v49 }
 0x143   :  { %129 = vst [vmem:[%s185_s3 + $0x8] sm:$0xff] %v127_v51  }

// kernel: bert_classifier_forward.15
= control target key start
LH: loop header
LB: loop body
LE: loop exit
PB: predicated region body
PF: predicated region fallthrough
CT: control target
= control target key end

     0   :  { %s438_s1 = inlined_call_operand.vmem [shape: bf16[128,128], index: 1, kind: input, shape index: {}]   ;;  %s439_s0 = inlined_call_operand.vmem [shape: bf16[32,128], index: 0, kind: input, shape index: {}]   ;;  %s440_s3 = inlined_call_operand.vmem [shape: bf16[32,128], index: 3, kind: input, shape index: {}]   ;;  %s441_s2 = inlined_call_operand.vmem [shape: f32[1,128], index: 2, kind: input, shape index: {}]   ;;  %s442_s4 = inlined_call_operand.vmem [shape: f32[1,128], index: 4, kind: input, shape index: {}]   ;;  %s443_s5 = inlined_call_operand.vmem [shape: f32[1,128], index: 5, kind: input, shape index: {}]   ;;  %s444_s6 = inlined_call_operand.vmem [shape: bf16[32,128], index: 6, kind: output, shape index: {}]  }
   0x1   :  { %v334_v0 = vld [vmem:[%s438_s1] sm:$0xff]   ;;  %v335_v1 = vld [vmem:[%s438_s1 + $0x8] sm:$0xff]   ;;  %v336_v2 = vld [vmem:[%s438_s1 + $0x10] sm:$0xff]  }
   0x2   :  { %314 = vmatprep.subr.bf16.mxu0 %v334_v0  ;;  %v337_v3 = vld [vmem:[%s438_s1 + $0x18] sm:$0xff]   ;;  %v342_v4 = vld [vmem:[%s439_s0] sm:$0xff]   ;;  %v339_v6 = vld [vmem:[%s438_s1 + $0x28] sm:$0xff]  }
   0x3   :  { %315 = vmatpush3.bf16.msra.mxu0 %v334_v0  ;;  %330 = vmatprep.mubr.bf16.mxu0 %v342_v4  ;;  %v338_v5 = vld [vmem:[%s438_s1 + $0x20] sm:$0xff]   ;;  %v340_v7 = vld [vmem:[%s438_s1 + $0x30] sm:$0xff]   ;;  %v341_v8 = vld [vmem:[%s438_s1 + $0x38] sm:$0xff]  }
   0x4   :  { %316 = vmatprep.subr.bf16.mxu0 %v335_v1  ;;  %v343_v9 = vld [vmem:[%s439_s0 + $0x8] sm:$0xff]   ;;  %v285_v11 = vld [vmem:[%s440_s3] sm:$0xff]  }
   0x5   :  { %v302_v10 = vld [vmem:[%s440_s3 + $0x8] sm:$0xff]   ;;  %v263_v12 = vld [vmem:[%s441_s2] ss:$0 sm:$0xff]  ;;  %v286_v15 = vunpack.c.l.bf16 %v285_v11  ;;  %v287_v26 = vunpack.c.h.bf16 %v285_v11 }
   0x6   :  { %v290_v13 = vunpack.c.l.bf16 %v302_v10  ;;  %v291_v23 = vunpack.c.h.bf16 %v302_v10  ;;  %v274_v59 = vld [vmem:[%s442_s4] ss:$0 sm:$0xff] }
   0x7   :  { %317 = vmatpush3.bf16.msra.mxu0 %v335_v1  ;;  %v275_v0 = vld [vmem:[%s443_s5] ss:$0 sm:$0xff] }
   0x8   :  { %318 = vmatprep.subr.bf16.mxu0 %v336_v2 }
   0xb   :  { %319 = vmatpush3.bf16.msra.mxu0 %v336_v2 }
   0xc   :  { %320 = vmatprep.subr.bf16.mxu0 %v337_v3 }
   0xf   :  { %321 = vmatpush3.bf16.msra.mxu0 %v337_v3 }
  0x10   :  { %322 = vmatprep.subr.bf16.mxu0 %v338_v5 }
  0x13   :  { %323 = vmatpush3.bf16.msra.mxu0 %v338_v5 }
  0x14   :  { %324 = vmatprep.subr.bf16.mxu0 %v339_v6 }
  0x17   :  { %325 = vmatpush3.bf16.msra.mxu0 %v339_v6 }
  0x18   :  { %326 = vmatprep.subr.bf16.mxu0 %v340_v7 }
  0x1b   :  { %327 = vmatpush3.bf16.msra.mxu0 %v340_v7 }
  0x1c   :  { %328 = vmatprep.subr.bf16.mxu0 %v341_v8 }
  0x1f   :  { %329 = vmatpush3.bf16.msra.mxu0 %v341_v8 }
  0x22   :  { %331 = vmatmul.mubr.bf16.vlgmr.msra.gmra.mrb[0].mxu0 %v343_v9 }
  0xf5   :  { %v332_v14 = vpop.f32.mrb[0].mxu0 }
  0xf6   :  { %v154_v16 = vadd.f32 %v332_v14, %v263_v12  ;;  %v145_v17 = vpop.f32.mrb[1].mxu0 }
  0xf7   :  { %v146_v18 = vadd.f32 %v263_v12, %v145_v17  ;;  %v333_v19 = vpop.f32.mrb[2].mxu0 }
  0xf8   :  { %v157_v20 = vadd.f32 %v333_v19, %v263_v12  ;;  %v148_v21 = vpop.f32.mrb[3].mxu0  ;;  %v170_v22 = vadd.f32 %v290_v13, %v154_v16 }
  0xf9   :  { %v149_v24 = vadd.f32 %v263_v12, %v148_v21  ;;  %v168_v25 = vadd.f32 %v286_v15, %v146_v18 }
  0xfa   :  { %178 = vadd.xlane.f32.xlu1 %v170_v22  ;;  %v171_v27 = vadd.f32 %v291_v23, %v157_v20 }
  0xfb   :  { %174 = vadd.xlane.f32.xlu0 %v168_v25  ;;  %v169_v28 = vadd.f32 %v287_v26, %v149_v24 }
  0xfe   :  { %180 = vadd.xlane.f32.xlu1 %v171_v27 }
  0xff   :  { %176 = vadd.xlane.f32.xlu0 %v169_v28 }
 0x187   :  { %v179_v29 = vpop.xlane.xlu1 %178 }
 0x188   :  { %v175_v30 = vpop.xlane.xlu0 %174  ;;  %v185_v31 = vmul.f32 0.0078125, %v179_v29 }
 0x189   :  { %v183_v32 = vmul.f32 0.0078125, %v175_v30 }
 0x18a   :  { %v189_v36 = vsub.f32 %v170_v22, %v185_v31 }
 0x18b   :  { %v187_v33 = vsub.f32 %v168_v25, %v183_v32  ;;  %v181_v34 = vpop.xlane.xlu1 %180 }
 0x18c   :  { %v177_v35 = vpop.xlane.xlu0 %176  ;;  %v186_v37 = vmul.f32 0.0078125, %v181_v34  ;;  %v193_v42 = vmul.f32 %v189_v36, %v189_v36 }
 0x18d   :  { %v184_v38 = vmul.f32 0.0078125, %v177_v35  ;;  %v191_v39 = vmul.f32 %v187_v33, %v187_v33 }
 0x18e   :  { %v190_v41 = vsub.f32 %v171_v27, %v186_v37 }
 0x18f   :  { %v188_v40 = vsub.f32 %v169_v28, %v184_v38  ;;  %195 = vadd.xlane.f32.xlu0 %v191_v39 }
 0x190   :  { %v194_v44 = vmul.f32 %v190_v41, %v190_v41 }
 0x191   :  { %v192_v43 = vmul.f32 %v188_v40, %v188_v40 }
 0x193   :  { %199 = vadd.xlane.f32.xlu0 %v193_v42  ;;  %197 = vadd.xlane.f32.xlu1 %v192_v43 }
 0x197   :  { %201 = vadd.xlane.f32.xlu1 %v194_v44 }
 0x21c   :  { %v196_v45 = vpop.xlane.xlu0 %195 }
 0x21d   :  { %v203_v46 = vmul.f32 0.0078125, %v196_v45 }
 0x21f   :  { %v207_v47 = vadd.f32 1e-12, %v203_v46 }
 0x220   :  { %v198_v48 = vpop.xlane.xlu1 %197  ;;  %v200_v49 = vpop.xlane.xlu0 %199 }
 0x221   :  { %344 = vrsqrt.f32 %v207_v47  ;;  %v204_v50 = vmul.f32 0.0078125, %v198_v48  ;;  %v205_v51 = vmul.f32 0.0078125, %v200_v49 }
 0x223   :  { %v208_v52 = vadd.f32 1e-12, %v204_v50  ;;  %v209_v53 = vadd.f32 1e-12, %v205_v51 }
 0x224   :  { %v202_v54 = vpop.xlane.xlu1 %201 }
 0x225   :  { %346 = vrsqrt.f32 %v208_v52  ;;  %v206_v55 = vmul.f32 0.0078125, %v202_v54 }
 0x226   :  { %348 = vrsqrt.f32 %v209_v53 }
 0x227   :  { %v210_v56 = vadd.f32 1e-12, %v206_v55 }
 0x229   :  { %350 = vrsqrt.f32 %v210_v56 }
 0x22b   :  { %v345_v57 = vpop.eup %344 }
 0x22c   :  { %v215_v58 = vmul.f32 %v345_v57, %v187_v33 }
 0x22e   :  { %v225_v62 = vmul.f32 %v274_v59, %v215_v58 }
 0x22f   :  { %v347_v60 = vpop.eup %346 }
 0x230   :  { %v349_v61 = vpop.eup %348  ;;  %v216_v63 = vmul.f32 %v347_v60, %v188_v40  ;;  %v235_v4 = vadd.f32 %v275_v0, %v225_v62 }
 0x231   :  { %v217_v1 = vmul.f32 %v349_v61, %v189_v36 }
 0x232   :  { %v226_v2 = vmul.f32 %v274_v59, %v216_v63 }
 0x233   :  { %v351_v3 = vpop.eup %350  ;;  %v227_v6 = vmul.f32 %v274_v59, %v217_v1 }
 0x234   :  { %v236_v5 = vadd.f32 %v275_v0, %v226_v2  ;;  %v218_v7 = vmul.f32 %v351_v3, %v190_v41 }
 0x235   :  { %v237_v10 = vadd.f32 %v275_v0, %v227_v6 }
 0x236   :  { %v295_v8 = vpack.c.bf16 %v236_v5, %v235_v4  ;;  %v228_v9 = vmul.f32 %v274_v59, %v218_v7 }
 0x238   :  { %296 = vst [vmem:[%s444_s6] sm:$0xff] %v295_v8   ;;  %v238_v11 = vadd.f32 %v275_v0, %v228_v9 }
 0x23a   :  { %v300_v12 = vpack.c.bf16 %v238_v11, %v237_v10 }
 0x23c   :  { %303 = vst [vmem:[%s444_s6 + $0x8] sm:$0xff] %v300_v12  }

// kernel: bert_classifier_forward.13
= control target key start
LH: loop header
LB: loop body
LE: loop exit
PB: predicated region body
PF: predicated region fallthrough
CT: control target
= control target key end

     0   :  { %v469_v1 = vmov 0   ;;  %v53_v27 = vlaneseq  ;;  %s595_s1 = inlined_call_operand.vmem [shape: bf16[128,384], index: 1, kind: input, shape index: {}]   ;;  %s596_s0 = inlined_call_operand.vmem [shape: bf16[32,128], index: 0, kind: input, shape index: {}]   ;;  %s597_s2 = inlined_call_operand.vmem [shape: f32[1,384], index: 2, kind: input, shape index: {}]   ;;  %s598_s3 = inlined_call_operand.vmem [shape: bf16[32,384], index: 3, kind: output, shape index: {}]  }
   0x1   :  { %v435_v0 = vld [vmem:[%s595_s1 + $0x4] ss:$12 sps:$4 sm:$0xff]   ;;  %240 = vmatprep.mubr.bf16.mxu0 %v469_v1  ;;  %v437_v2 = vld [vmem:[%s595_s1] ss:$12 sps:$4 sm:$0xff]   ;;  %v438_v3 = vld [vmem:[%s595_s1 + $0x1c] ss:$12 sps:$4 sm:$0xff]  }
   0x2   :  { %208 = vmatprep.subr.bf16.mxu0 %v435_v0  ;;  %v440_v4 = vld [vmem:[%s595_s1 + $0x18] ss:$12 sps:$4 sm:$0xff]   ;;  %v441_v5 = vld [vmem:[%s595_s1 + $0x8] ss:$12 sps:$4 sm:$0xff]   ;;  %v445_v7 = vld [vmem:[%s595_s1 + $0x20] ss:$12 sps:$4 sm:$0xff]  }
   0x3   :  { %209 = vmatpush1.bf16.msra.mxu0 %v437_v2  ;;  %v442_v6 = vld [vmem:[%s595_s1 + $0x34] ss:$12 sps:$4 sm:$0xff]   ;;  %414 = vmatprep.subr.bf16.mxu1 %v441_v5  ;;  %v444_v8 = vld [vmem:[%s595_s1 + $0x30] ss:$12 sps:$4 sm:$0xff]   ;;  %v446_v9 = vld [vmem:[%s595_s1 + $0x4c] ss:$12 sps:$4 sm:$0xff]  }
   0x4   :  { %210 = vmatprep.subr.bf16.mxu0 %v438_v3  ;;  %415 = vmatpush3.bf16.msra.mxu1 %v441_v5  ;;  %v449_v10 = vld [vmem:[%s595_s1 + $0x38] ss:$12 sps:$4 sm:$0xff]   ;;  %v448_v11 = vld [vmem:[%s595_s1 + $0x48] ss:$12 sps:$4 sm:$0xff]   ;;  %v453_v12 = vld [vmem:[%s595_s1 + $0x50] ss:$12 sps:$4 sm:$0xff]  }
   0x5   :  { %416 = vmatprep.subr.bf16.mxu1 %v445_v7  ;;  %v450_v13 = vld [vmem:[%s595_s1 + $0x64] ss:$12 sps:$4 sm:$0xff]   ;;  %v452_v14 = vld [vmem:[%s595_s1 + $0x60] ss:$12 sps:$4 sm:$0xff]   ;;  %v457_v15 = vld [vmem:[%s595_s1 + $0x68] ss:$12 sps:$4 sm:$0xff]  }
   0x6   :  { %v454_v16 = vld [vmem:[%s595_s1 + $0x7c] ss:$12 sps:$4 sm:$0xff]   ;;  %v456_v17 = vld [vmem:[%s595_s1 + $0x78] ss:$12 sps:$4 sm:$0xff]   ;;  %v461_v19 = vld [vmem:[%s595_s1 + $0x80] ss:$12 sps:$4 sm:$0xff]  }
   0x7   :  { %211 = vmatpush1.bf16.msra.mxu0 %v440_v4  ;;  %v466_v18 = vld [vmem:[%s596_s0] sm:$0xff]   ;;  %v460_v21 = vld [vmem:[%s595_s1 + $0x90] ss:$12 sps:$4 sm:$0xff]   ;;  %v462_v23 = vld [vmem:[%s595_s1 + $0xac] ss:$12 sps:$4 sm:$0xff]   ;;  %v54_v28 = vshrl.u32 %v53_v27, 7 }
   0x8   :  { %212 = vmatprep.subr.bf16.mxu0 %v442_v6  ;;  %417 = vmatpush3.bf16.msra.mxu1 %v445_v7  ;;  %v458_v20 = vld [vmem:[%s595_s1 + $0x94] ss:$12 sps:$4 sm:$0xff]   ;;  %v465_v22 = vld [vmem:[%s595_s1 + $0x98] ss:$12 sps:$4 sm:$0xff]   ;;  %v467_v25 = vld [vmem:[%s595_s1 + $0xb0] ss:$12 sps:$4 sm:$0xff]  }
   0x9   :  { %418 = vmatprep.subr.bf16.mxu1 %v449_v10  ;;  %430 = vmatprep.mubr.bf16.mxu1 %v466_v18  ;;  %v464_v24 = vld [vmem:[%s595_s1 + $0xa8] ss:$12 sps:$4 sm:$0xff]   ;;  %v55_v29 = vsub.s32 0, %v54_v28  ;;  %v51_v30 = vld [vmem:[%s597_s2] sm:$0x7]  ;;  %v59_v31 = vsub.s32 1, %v54_v28 }
   0xa   :  { %v468_v26 = vld [vmem:[%s596_s0 + $0x8] sm:$0xff]   ;;  %v63_v32 = vsub.s32 2, %v54_v28 }
   0xb   :  { %213 = vmatpush1.bf16.msra.mxu0 %v444_v8  ;;  %v56_v33 = vrot.slane %v51_v30, %v55_v29  ;;  %v60_v34 = vrot.slane %v51_v30, %v59_v31 }
   0xc   :  { %214 = vmatprep.subr.bf16.mxu0 %v446_v9  ;;  %419 = vmatpush3.bf16.msra.mxu1 %v449_v10  ;;  %v64_v36 = vrot.slane %v51_v30, %v63_v32 }
   0xd   :  { %420 = vmatprep.subr.bf16.mxu1 %v453_v12 }
   0xf   :  { %215 = vmatpush1.bf16.msra.mxu0 %v448_v11 }
  0x10   :  { %216 = vmatprep.subr.bf16.mxu0 %v450_v13  ;;  %421 = vmatpush3.bf16.msra.mxu1 %v453_v12 }
  0x11   :  { %422 = vmatprep.subr.bf16.mxu1 %v457_v15 }
  0x13   :  { %217 = vmatpush1.bf16.msra.mxu0 %v452_v14 }
  0x14   :  { %218 = vmatprep.subr.bf16.mxu0 %v454_v16  ;;  %423 = vmatpush3.bf16.msra.mxu1 %v457_v15 }
  0x15   :  { %424 = vmatprep.subr.bf16.mxu1 %v461_v19 }
  0x17   :  { %219 = vmatpush1.bf16.msra.mxu0 %v456_v17 }
  0x18   :  { %220 = vmatprep.subr.bf16.mxu0 %v458_v20  ;;  %425 = vmatpush3.bf16.msra.mxu1 %v461_v19 }
  0x19   :  { %426 = vmatprep.subr.bf16.mxu1 %v465_v22 }
  0x1b   :  { %221 = vmatpush1.bf16.msra.mxu0 %v460_v21 }
  0x1c   :  { %222 = vmatprep.subr.bf16.mxu0 %v462_v23  ;;  %427 = vmatpush3.bf16.msra.mxu1 %v465_v22 }
  0x1d   :  { %428 = vmatprep.subr.bf16.mxu1 %v467_v25 }
  0x1f   :  { %223 = vmatpush1.bf16.msra.mxu0 %v464_v24 }
  0x20   :  { %429 = vmatpush3.bf16.msra.mxu1 %v467_v25 }
  0x22   :  { %241 = vmatmul.mubr.bf16.vlgmr.msra.gmra.mrb[0].mxu0 %v466_v18 }
  0x23   :  { %250 = vmatprep.mubr.bf16.mxu0 %v469_v1  ;;  %431 = vmatmul.mubr.bf16.vlgmr.msra.gmra.mrb[0].mxu1 %v468_v26 }
  0x2a   :  { %251 = vmatmul.mubr.bf16.gmra.mrb[4].mxu0 %v468_v26 }
  0xf5   :  { %v242_v35 = vpop.f32.mrb[0].mxu0 }
  0xf6   :  { %v243_v37 = vadd.f32 %v242_v35, %v56_v33  ;;  %v244_v38 = vpop.f32.mrb[1].mxu0  ;;  %v432_v43 = vpop.f32.mrb[0].mxu1 }
  0xf7   :  { %v245_v39 = vadd.f32 %v244_v38, %v60_v34  ;;  %v246_v40 = vpop.f32.mrb[2].mxu0  ;;  %v304_v46 = vadd.f32 %v432_v43, %v64_v36  ;;  %v295_v47 = vpop.f32.mrb[1].mxu1 }
  0xf8   :  { %v247_v41 = vadd.f32 %v246_v40, %v56_v33  ;;  %v248_v42 = vpop.f32.mrb[3].mxu0  ;;  %v296_v48 = vadd.f32 %v295_v47, %v64_v36  ;;  %v433_v49 = vpop.f32.mrb[2].mxu1 }
  0xf9   :  { %v396_v44 = vpack.c.bf16 %v245_v39, %v243_v37  ;;  %v249_v45 = vadd.f32 %v248_v42, %v60_v34  ;;  %v401_v51 = vpack.c.bf16 %v304_v46, %v304_v46  ;;  %v307_v52 = vadd.f32 %v433_v49, %v64_v36  ;;  %v298_v53 = vpop.f32.mrb[3].mxu1 }
  0xfa   :  { %v397_v54 = vpack.c.bf16 %v296_v48, %v296_v48  ;;  %v299_v55 = vadd.f32 %v298_v53, %v64_v36 }
  0xfb   :  { %350 = vst [vmem:[%s598_s3] sm:$0xff] %v396_v44  ;;  %v398_v50 = vpack.c.bf16 %v249_v45, %v247_v41  ;;  %355 = vst [vmem:[%s598_s3 + $0x20] sm:$0xf] %v401_v51  ;;  %v403_v56 = vpack.c.bf16 %v307_v52, %v307_v52 }
  0xfc   :  { %351 = vst [vmem:[%s598_s3 + $0x8] sm:$0xf] %v397_v54  ;;  %v399_v59 = vpack.c.bf16 %v299_v55, %v299_v55 }
  0xfd   :  { %352 = vst [vmem:[%s598_s3 + $0xc] sm:$0xff] %v398_v50  ;;  %v252_v57 = vpop.f32.mrb[4].mxu0  ;;  %357 = vst [vmem:[%s598_s3 + $0x2c] sm:$0xf] %v403_v56 }
  0xfe   :  { %v253_v58 = vadd.f32 %v252_v57, %v56_v33  ;;  %v254_v60 = vpop.f32.mrb[5].mxu0  ;;  %353 = vst [vmem:[%s598_s3 + $0x14] sm:$0xf] %v399_v59 }
  0xff   :  { %v255_v61 = vadd.f32 %v254_v60, %v60_v34  ;;  %v256_v62 = vpop.f32.mrb[6].mxu0 }
 0x100   :  { %v257_v63 = vadd.f32 %v256_v62, %v56_v33  ;;  %v258_v0 = vpop.f32.mrb[7].mxu0 }
 0x101   :  { %v400_v1 = vpack.c.bf16 %v255_v61, %v253_v58  ;;  %v259_v2 = vadd.f32 %v258_v0, %v60_v34 }
 0x103   :  { %354 = vst [vmem:[%s598_s3 + $0x18] sm:$0xff] %v400_v1  ;;  %v402_v3 = vpack.c.bf16 %v259_v2, %v257_v63 }
 0x105   :  { %356 = vst [vmem:[%s598_s3 + $0x24] sm:$0xff] %v402_v3 }

// kernel: bert_classifier_forward.14
= control target key start
LH: loop header
LB: loop body
LE: loop exit
PB: predicated region body
PF: predicated region fallthrough
CT: control target
= control target key end

     0   :  { %s981_s9 = smov 0   ;;  %s1098_s0 = inlined_call_operand.vmem [shape: bf16[32,384], index: 0, kind: input, shape index: {}]   ;;  %s1099_s1 = inlined_call_operand.vmem [shape: f32[2,1,16], index: 1, kind: input, shape index: {}]   ;;  %s1100_s2 = inlined_call_operand.vmem [shape: bf16[32,128], index: 2, kind: output, shape index: {}]  }
   0x1 LB: > { %s792_s10 = sadd.s32 4294967295, %s959_s9   ;;  %p796_p0 = scmp.ge.s32.totalorder %s959_s9, 1  ;;  %s959_s9 = sphi %s981_s9, %s12_s9  }
   0x2   : > { %p122_p1 = scmp.lt.s32.totalorder %s959_s9, 3 }
   0x4   : > { %p123_p2 = pnand %p796_p0, %p122_p1 }
   0x5   : > { %s797_s11 = sshll.u32 (!%p123_p2), %s792_s10, 1  ;;  %v961_v0 = vmov (!%p123_p2), 0.0   ;;  %vm962_vm0 = vmmov (!%p123_p2), 0   ;;  %vm178_vm1 = vcmask (!%p123_p2), 261120   ;;  %p155_p4 = scmp.lt.s32.totalorder (!%p123_p2), %s792_s10, 1  ;;  %vm236_vm2 = vcmask (!%p123_p2), 130048  }
   0x6   : > { %126 = sbr.rel (%p123_p2) target bundleno = 1504 (0x5e0), region = 28  ;;  %840 = vmatprep.subr.bf16.mxu0 (!%p123_p2), %v961_v0  ;;  %p149_p3 = scmp.lt.s32.totalorder (!%p123_p2), %s797_s11, 3  ;;  %842 = vmatprep.mubr.msk.bf16.mxu0 (!%p123_p2), %vm962_vm0, %v961_v0  ;;  %vm711_vm3 = vcmask (!%p123_p2), 523264   ;;  %vm714_vm4 = vcmask (!%p123_p2), 785408  }
   0x7   : > { %846 = vmatprep.subr.bf16.mxu1 (!%p123_p2), %v961_v0  ;;  %848 = vmatprep.mubr.msk.bf16.mxu1 (!%p123_p2), %vm962_vm0, %v961_v0  ;;  %s963_s19 = smov (!%p123_p2), 96   ;;  %s964_s20 = smov (!%p123_p2), 32  }
   0x8   : > { %s965_s21 = smov (!%p123_p2), 64  }
   0xd   : > { %s1102_s11 = smov (!%p149_p3, %s797_s11), 3  ;;  %s1104_s10 = smov (!%p155_p4, %s792_s10), 1 }
   0xe   : > { %s888_s12 = smul.u32 12, %s1102_s11  ;;  %s157_s18 = scalar_lea.vmem %s1099_s1, %s1104_s10 }
   0xf   : > { %v1013_v5 = vld [vmem:[%s157_s18] ss:$0 sm:$0xff]  ;;  %s800_s22 = sshll.u32 %s1102_s11, 2 }
  0x10   : > { %s1001_s15 = scalar_lea.vmem %s1098_s0, %s888_s12  ;;  %s162_s25 = scalar_lea.vmem %s1100_s2, %s800_s22 }
  0x11   : > { %v917_v1 = vld [vmem:[%s1001_s15 + $0x4] ss:$12 sps:$4 sm:$0xff]   ;;  %v919_v3 = vld [vmem:[%s1001_s15] ss:$12 sps:$4 sm:$0xff]   ;;  %v1024_v25 = vld [vmem:[%s1001_s15 + $0x8] ss:$12 sps:$4 sm:$0xff]  }
  0x12   : > { %v183_v2 = vsel %vm178_vm1, %v917_v1, 0  ;;  %847 = vmatpush3.bf16.msra.mxu1 %v1024_v25 }
  0x13   : > { %841 = vmatpush3.bf16.xpose.msra.mxu0 %v183_v2  ;;  %852 = vmatprep.subr.bf16.mxu1 %v961_v0 }
  0x14   : > { %858 = vmatprep.subr.bf16.mxu0 %v961_v0 }
  0x1a   : > { %843 = vmatmul.mubr.msk.bf16.vlgmr.msra.gmra.mrb[0].mxu0 %vm178_vm1, %v919_v3 }
  0x1b   : > { %860 = vmatprep.mubr.msk.bf16.mxu0 %vm962_vm0, %v961_v0 }
  0xed   : > { %v219_v4 = vpop.f32.mrb[0].mxu0 }
  0xee   : > { %v226_v6 = vmul.f32 0.17677669, %v219_v4  ;;  %v844_v7 = vpop.f32.mrb[1].mxu0 }
  0xef   : > { %v222_v8 = vpop.f32.mrb[2].mxu0 }
  0xf0   : > { %v227_v9 = vmul.f32 0.17677669, %v222_v8  ;;  %v845_v10 = vpop.f32.mrb[3].mxu0  ;;  %v234_v11 = vadd.f32 %v1013_v5, %v226_v6 }
  0xf2   : > { %v237_v12 = vsel %vm236_vm2, %v234_v11, -inf  ;;  %v235_v13 = vadd.f32 %v1013_v5, %v227_v9 }
  0xf3   : > { %238 = vmax.xlane.f32.xlu0 %v237_v12 }
  0xf4   : > { %v240_v14 = vsel %vm236_vm2, %v235_v13, -inf }
  0xf7   : > { %241 = vmax.xlane.f32.xlu0 %v240_v14 }
 0x10d   : > { %312 = vrot.lane.b32.xlu0 %v917_v1, %s963_s19 }
 0x111   : > { %562 = vrot.lane.b32.xlu0 %v917_v1, %s964_s20 }
 0x180   : > { %v239_v15 = vpop.xlane.xlu0 %238 }
 0x181   : > { %v243_v16 = vsub.f32 %v234_v11, %v239_v15 }
 0x183   : > { %v245_v17 = vmul.f32 1.442695, %v243_v16 }
 0x184   : > { %v242_v18 = vpop.xlane.xlu0 %241 }
 0x185   : > { %921 = vpow2.f32 %v245_v17  ;;  %v244_v19 = vsub.f32 %v235_v13, %v242_v18 }
 0x187   : > { %v247_v20 = vmul.f32 1.442695, %v244_v19 }
 0x188   : > { %v313_v30 = vpop.permute.xlu0 %312 }
 0x189   : > { %923 = vpow2.f32 %v247_v20  ;;  %v318_v34 = vsel %vm178_vm1, %v313_v30, 0 }
 0x18c   : > { %v563_v38 = vpop.permute.xlu0 %562 }
 0x18d   : > { %v568_v40 = vsel %vm178_vm1, %v563_v38, 0 }
 0x18f   : > { %v922_v21 = vpop.eup %921 }
 0x190   : > { %v249_v22 = vsel %vm236_vm2, %v922_v21, 0.0 }
 0x191   : > { %250 = vadd.xlane.f32.xlu1 %v249_v22 }
 0x193   : > { %v924_v23 = vpop.eup %923 }
 0x194   : > { %v252_v24 = vsel %vm236_vm2, %v924_v23, 0.0 }
 0x195   : > { %253 = vadd.xlane.f32.xlu1 %v252_v24 }
 0x1a6   : > { %310 = vrot.lane.b32.xlu1 %v919_v3, %s963_s19 }
 0x1aa   : > { %437 = vrot.lane.b32.xlu1 %v917_v1, %s965_s21 }
 0x1ae   : > { %435 = vrot.lane.b32.xlu1 %v919_v3, %s965_s21 }
 0x1b2   : > { %560 = vrot.lane.b32.xlu1 %v919_v3, %s964_s20 }
 0x21e   : > { %v251_v26 = vpop.xlane.xlu1 %250 }
 0x21f   : > { %925 = vrcp.f32 %v251_v26 }
 0x222   : > { %v254_v27 = vpop.xlane.xlu1 %253 }
 0x223   : > { %927 = vrcp.f32 %v254_v27 }
 0x226   : > { %v311_v33 = vpop.permute.xlu1 %310 }
 0x229   : > { %v926_v28 = vpop.eup %925 }
 0x22a   : > { %v257_v31 = vmul.f32 %v926_v28, %v922_v21  ;;  %v438_v36 = vpop.permute.xlu1 %437 }
 0x22b   : > { %v443_v37 = vsel %vm178_vm1, %v438_v36, 0 }
 0x22d   : > { %v928_v29 = vpop.eup %927 }
 0x22e   : > { %v258_v32 = vmul.f32 %v928_v29, %v924_v23  ;;  %v436_v39 = vpop.permute.xlu1 %435 }
 0x230   : > { %v259_v35 = vpack.c.bf16 %v258_v32, %v257_v31 }
 0x232   : > { %849 = vmatmul.mubr.msk.bf16.vlgmr.msra.gmra.mrb[0].mxu1 %vm236_vm2, %v259_v35  ;;  %v561_v41 = vpop.permute.xlu1 %560 }
 0x233   : > { %853 = vmatpush3.bf16.xpose.msra.mxu1 %v318_v34  ;;  %854 = vmatprep.mubr.msk.bf16.mxu1 %vm962_vm0, %v961_v0 }
 0x234   : > { %864 = vmatprep.subr.bf16.mxu1 %v961_v0 }
 0x23a   : > { %855 = vmatmul.mubr.msk.bf16.vlgmr.msra.gmra.mrb[4].mxu1 %vm178_vm1, %v311_v33 }
 0x23b   : > { %865 = vmatpush3.bf16.xpose.msra.mxu1 %v443_v37  ;;  %866 = vmatprep.mubr.msk.bf16.mxu1 %vm962_vm0, %v961_v0 }
 0x23c   : > { %876 = vmatprep.subr.bf16.mxu1 %v961_v0 }
 0x242   : > { %867 = vmatmul.mubr.msk.bf16.vlgmr.msra.gmra.mrb[8].mxu1 %vm178_vm1, %v436_v39 }
 0x243   : > { %877 = vmatpush3.bf16.xpose.msra.mxu1 %v568_v40  ;;  %878 = vmatprep.mubr.msk.bf16.mxu1 %vm962_vm0, %v961_v0 }
 0x24a   : > { %879 = vmatmul.mubr.msk.bf16.vlgmr.msra.gmra.mrb[12].mxu1 %vm178_vm1, %v561_v41 }
 0x305   : > { %v1047_v42 = vpop.f32.mrb[0].mxu1 }
 0x306   : > { %v850_v43 = vpop.f32.mrb[1].mxu1 }
 0x307   : > { %v1049_v44 = vpop.f32.mrb[2].mxu1 }
 0x308   : > { %v851_v45 = vpop.f32.mrb[3].mxu1 }
 0x30d   : > { %v354_v46 = vpop.f32.mrb[4].mxu1 }
 0x30e   : > { %v361_v47 = vmul.f32 0.17677669, %v354_v46  ;;  %v856_v48 = vpop.f32.mrb[5].mxu1 }
 0x30f   : > { %v357_v49 = vpop.f32.mrb[6].mxu1 }
 0x310   : > { %v362_v50 = vmul.f32 0.17677669, %v357_v49  ;;  %v857_v51 = vpop.f32.mrb[7].mxu1  ;;  %v363_v52 = vadd.f32 %v1013_v5, %v361_v47 }
 0x312   : > { %v365_v53 = vsel %vm236_vm2, %v363_v52, -inf  ;;  %v364_v54 = vadd.f32 %v1013_v5, %v362_v50 }
 0x313   : > { %366 = vmax.xlane.f32.xlu0 %v365_v53 }
 0x314   : > { %v368_v55 = vsel %vm236_vm2, %v364_v54, -inf }
 0x315   : > { %369 = vmax.xlane.f32.xlu1 %v368_v55  ;;  %v479_v56 = vpop.f32.mrb[8].mxu1 }
 0x316   : > { %v486_v57 = vmul.f32 0.17677669, %v479_v56  ;;  %v868_v58 = vpop.f32.mrb[9].mxu1 }
 0x317   : > { %v482_v59 = vpop.f32.mrb[10].mxu1 }
 0x318   : > { %v487_v60 = vmul.f32 0.17677669, %v482_v59  ;;  %v869_v61 = vpop.f32.mrb[11].mxu1  ;;  %v488_v62 = vadd.f32 %v1013_v5, %v486_v57 }
 0x31a   : > { %v490_v63 = vsel %vm236_vm2, %v488_v62, -inf  ;;  %v489_v1 = vadd.f32 %v1013_v5, %v487_v60 }
 0x31b   : > { %491 = vmax.xlane.f32.xlu0 %v490_v63 }
 0x31c   : > { %v493_v6 = vsel %vm236_vm2, %v489_v1, -inf }
 0x31d   : > { %v604_v2 = vpop.f32.mrb[12].mxu1 }
 0x31e   : > { %v611_v3 = vmul.f32 0.17677669, %v604_v2  ;;  %v880_v4 = vpop.f32.mrb[13].mxu1 }
 0x31f   : > { %494 = vmax.xlane.f32.xlu0 %v493_v6  ;;  %v607_v7 = vpop.f32.mrb[14].mxu1 }
 0x320   : > { %v612_v8 = vmul.f32 0.17677669, %v607_v7  ;;  %v613_v9 = vadd.f32 %v1013_v5, %v611_v3  ;;  %v881_v10 = vpop.f32.mrb[15].mxu1 }
 0x322   : > { %v615_v11 = vsel %vm236_vm2, %v613_v9, -inf  ;;  %v614_v12 = vadd.f32 %v1013_v5, %v612_v8 }
 0x323   : > { %616 = vmax.xlane.f32.xlu0 %v615_v11 }
 0x324   : > { %v618_v13 = vsel %vm236_vm2, %v614_v12, -inf }
 0x325   : > { %619 = vmax.xlane.f32.xlu1 %v618_v13 }
 0x3a0   : > { %v367_v14 = vpop.xlane.xlu0 %366 }
 0x3a1   : > { %v371_v15 = vsub.f32 %v363_v52, %v367_v14 }
 0x3a2   : > { %v370_v16 = vpop.xlane.xlu1 %369 }
 0x3a3   : > { %v373_v17 = vmul.f32 1.442695, %v371_v15  ;;  %v372_v18 = vsub.f32 %v364_v54, %v370_v16 }
 0x3a5   : > { %929 = vpow2.f32 %v373_v17  ;;  %v375_v19 = vmul.f32 1.442695, %v372_v18 }
 0x3a7   : > { %931 = vpow2.f32 %v375_v19 }
 0x3a8   : > { %v492_v20 = vpop.xlane.xlu0 %491 }
 0x3a9   : > { %v496_v21 = vsub.f32 %v488_v62, %v492_v20 }
 0x3ab   : > { %v498_v22 = vmul.f32 1.442695, %v496_v21 }
 0x3ac   : > { %v495_v23 = vpop.xlane.xlu0 %494 }
 0x3ad   : > { %933 = vpow2.f32 %v498_v22  ;;  %v497_v24 = vsub.f32 %v489_v1, %v495_v23 }
 0x3af   : > { %v930_v26 = vpop.eup %929  ;;  %v500_v5 = vmul.f32 1.442695, %v497_v24 }
 0x3b0   : > { %v617_v27 = vpop.xlane.xlu0 %616  ;;  %v377_v28 = vsel %vm236_vm2, %v930_v26, 0.0 }
 0x3b1   : > { %v932_v29 = vpop.eup %931  ;;  %935 = vpow2.f32 %v500_v5  ;;  %v621_v30 = vsub.f32 %v613_v9, %v617_v27  ;;  %378 = vadd.xlane.f32.xlu0 %v377_v28 }
 0x3b2   : > { %v380_v31 = vsel %vm236_vm2, %v932_v29, 0.0  ;;  %v620_v39 = vpop.xlane.xlu1 %619 }
 0x3b3   : > { %v623_v32 = vmul.f32 1.442695, %v621_v30  ;;  %381 = vadd.xlane.f32.xlu1 %v380_v31  ;;  %v622_v40 = vsub.f32 %v614_v12, %v620_v39 }
 0x3b5   : > { %937 = vpow2.f32 %v623_v32  ;;  %v625_v41 = vmul.f32 1.442695, %v622_v40 }
 0x3b7   : > { %v934_v33 = vpop.eup %933  ;;  %939 = vpow2.f32 %v625_v41 }
 0x3b8   : > { %v502_v34 = vsel %vm236_vm2, %v934_v33, 0.0 }
 0x3b9   : > { %503 = vadd.xlane.f32.xlu0 %v502_v34 }
 0x3bb   : > { %v936_v35 = vpop.eup %935 }
 0x3bc   : > { %v505_v36 = vsel %vm236_vm2, %v936_v35, 0.0 }
 0x3bd   : > { %506 = vadd.xlane.f32.xlu1 %v505_v36 }
 0x3bf   : > { %v938_v37 = vpop.eup %937 }
 0x3c0   : > { %v627_v38 = vsel %vm236_vm2, %v938_v37, 0.0 }
 0x3c1   : > { %628 = vadd.xlane.f32.xlu0 %v627_v38  ;;  %v940_v43 = vpop.eup %939 }
 0x3c2   : > { %v630_v45 = vsel %vm236_vm2, %v940_v43, 0.0 }
 0x3ce   : > { %513 = vrot.lane.b32.xlu1 %v1024_v25, %s965_s21 }
 0x3d7   : > { %388 = vrot.lane.b32.xlu0 %v1024_v25, %s963_s19 }
 0x3f2   : > { %631 = vadd.xlane.f32.xlu1 %v630_v45 }
 0x403   : > { %638 = vrot.lane.b32.xlu1 %v1024_v25, %s964_s20 }
 0x43e   : > { %v379_v47 = vpop.xlane.xlu0 %378 }
 0x440   : > { %v382_v46 = vpop.xlane.xlu1 %381 }
 0x441   : > { %941 = vrcp.f32 %v382_v46 }
 0x442   : > { %943 = vrcp.f32 %v379_v47 }
 0x446   : > { %v504_v48 = vpop.xlane.xlu0 %503 }
 0x44a   : > { %v507_v49 = vpop.xlane.xlu1 %506 }
 0x44b   : > { %945 = vrcp.f32 %v507_v49  ;;  %v942_v50 = vpop.eup %941 }
 0x44c   : > { %947 = vrcp.f32 %v504_v48  ;;  %v944_v52 = vpop.eup %943  ;;  %v386_v53 = vmul.f32 %v942_v50, %v932_v29 }
 0x44d   : > { %v385_v54 = vmul.f32 %v944_v52, %v930_v26 }
 0x44e   : > { %v629_v51 = vpop.xlane.xlu0 %628  ;;  %v514_v25 = vpop.permute.xlu1 %513 }
 0x44f   : > { %v387_v56 = vpack.c.bf16 %v386_v53, %v385_v54  ;;  %949 = vrcp.f32 %v629_v51 }
 0x452   : > { %v389_v55 = vpop.permute.xlu0 %388 }
 0x453   : > { %859 = vmatpush3.bf16.msra.mxu0 %v389_v55 }
 0x454   : > { %870 = vmatprep.subr.bf16.mxu0 %v961_v0 }
 0x455   : > { %v946_v57 = vpop.eup %945 }
 0x456   : > { %861 = vmatmul.mubr.msk.bf16.vlgmr.msra.gmra.mrb[4].mxu0 %vm236_vm2, %v387_v56  ;;  %v948_v58 = vpop.eup %947  ;;  %v511_v59 = vmul.f32 %v946_v57, %v936_v35 }
 0x457   : > { %871 = vmatpush3.bf16.msra.mxu0 %v514_v25  ;;  %872 = vmatprep.mubr.msk.bf16.mxu0 %vm962_vm0, %v961_v0  ;;  %v510_v60 = vmul.f32 %v948_v58, %v934_v33 }
 0x458   : > { %882 = vmatprep.subr.bf16.mxu0 %v961_v0 }
 0x459   : > { %v512_v61 = vpack.c.bf16 %v511_v59, %v510_v60  ;;  %v950_v1 = vpop.eup %949 }
 0x45a   : > { %v635_v3 = vmul.f32 %v950_v1, %v938_v37 }
 0x45e   : > { %873 = vmatmul.mubr.msk.bf16.vlgmr.msra.gmra.mrb[8].mxu0 %vm236_vm2, %v512_v61 }
 0x45f   : > { %884 = vmatprep.mubr.msk.bf16.mxu0 %vm962_vm0, %v961_v0 }
 0x47f   : > { %v632_v62 = vpop.xlane.xlu1 %631 }
 0x480   : > { %951 = vrcp.f32 %v632_v62 }
 0x483   : > { %v639_v63 = vpop.permute.xlu1 %638 }
 0x484   : > { %883 = vmatpush3.bf16.msra.mxu0 %v639_v63 }
 0x48a   : > { %v952_v2 = vpop.eup %951 }
 0x48b   : > { %v636_v4 = vmul.f32 %v952_v2, %v940_v43 }
 0x48d   : > { %v637_v6 = vpack.c.bf16 %v636_v4, %v635_v3 }
 0x48f   : > { %885 = vmatmul.mubr.msk.bf16.vlgmr.msra.gmra.mrb[12].mxu0 %vm236_vm2, %v637_v6 }
 0x529   : > { %v428_v7 = vpop.f32.mrb[4].mxu0 }
 0x52a   : > { %v862_v8 = vpop.f32.mrb[5].mxu0 }
 0x52b   : > { %v431_v9 = vpop.f32.mrb[6].mxu0 }
 0x52c   : > { %v902_v10 = vpack.i.bf16 %v431_v9, %v428_v7  ;;  %v863_v11 = vpop.f32.mrb[7].mxu0 }
 0x52e   : > { %903 = vrot.lane.b32.xlu1 %v902_v10, %s964_s20 }
 0x531   : > { %v553_v0 = vpop.f32.mrb[8].mxu0 }
 0x532   : > { %v874_v12 = vpop.f32.mrb[9].mxu0 }
 0x533   : > { %v556_v13 = vpop.f32.mrb[10].mxu0 }
 0x534   : > { %v907_v14 = vpack.i.bf16 %v556_v13, %v553_v0  ;;  %v875_v15 = vpop.f32.mrb[11].mxu0 }
 0x536   : > { %908 = vrot.lane.b32.xlu0 %v907_v14, %s965_s21 }
 0x562   : > { %v678_v16 = vpop.f32.mrb[12].mxu0 }
 0x563   : > { %v886_v17 = vpop.f32.mrb[13].mxu0 }
 0x564   : > { %v681_v18 = vpop.f32.mrb[14].mxu0 }
 0x565   : > { %v912_v19 = vpack.i.bf16 %v681_v18, %v678_v16  ;;  %v887_v20 = vpop.f32.mrb[15].mxu0 }
 0x567   : > { %913 = vrot.lane.b32.xlu1 %v912_v19, %s963_s19 }
 0x5a0   : > { %v904_v21 = vpop.permute.xlu1 %903 }
 0x5a1   : > { %v906_v23 = vunpack.i.h.bf16 %v904_v21  ;;  %v905_v24 = vunpack.i.l.bf16 %v904_v21 }
 0x5a3   : > { %v710_v28 = vsel %vm178_vm1, %v1049_v44, %v906_v23  ;;  %v709_v29 = vsel %vm178_vm1, %v1047_v42, %v905_v24 }
 0x5a8   : > { %v909_v22 = vpop.permute.xlu0 %908 }
 0x5a9   : > { %v911_v26 = vunpack.i.h.bf16 %v909_v22  ;;  %v910_v5 = vunpack.i.l.bf16 %v909_v22 }
 0x5ab   : > { %v713_v32 = vsel %vm711_vm3, %v710_v28, %v911_v26  ;;  %v712_v33 = vsel %vm711_vm3, %v709_v29, %v910_v5 }
 0x5d9   : > { %v914_v27 = vpop.permute.xlu1 %913 }
 0x5da   : > { %v916_v30 = vunpack.i.h.bf16 %v914_v27  ;;  %v915_v31 = vunpack.i.l.bf16 %v914_v27 }
 0x5dc   : > { %v716_v34 = vsel %vm714_vm4, %v713_v32, %v916_v30  ;;  %v715_v35 = vsel %vm714_vm4, %v712_v33, %v915_v31 }
 0x5dd   : > { %v822_v36 = vpack.c.bf16 %v716_v34, %v715_v35 }
 0x5df   : > { %823 = vst [vmem:[%s162_s25] sm:$0xff] %v822_v36  }
 0x5e0 PF: > { %s12_s9 = sadd.s32 1, %s959_s9  }
 0x5e1   : > { %p9_p5 = scmp.ge.s32.totalorder %s12_s9, 4  }
 0x5e3   :  { %11 = sbr.rel (!%p9_p5) target bundleno = 1 (0x1), region = 61 }

// kernel: bert_classifier_forward.16
= control target key start
LH: loop header
LB: loop body
LE: loop exit
PB: predicated region body
PF: predicated region fallthrough
CT: control target
= control target key end

     0   :  { %v381_v1 = vmov 0   ;;  %v37_v19 = vlaneseq  ;;  %s527_s1 = inlined_call_operand.vmem [shape: bf16[128,256], index: 1, kind: input, shape index: {}]   ;;  %s528_s0 = inlined_call_operand.vmem [shape: bf16[32,128], index: 0, kind: input, shape index: {}]   ;;  %s529_s2 = inlined_call_operand.vmem [shape: f32[1,256], index: 2, kind: input, shape index: {}]   ;;  %s530_s3 = inlined_call_operand.vmem [shape: bf16[32,256], index: 3, kind: output, shape index: {}]  }
   0x1   :  { %v339_v0 = vld [vmem:[%s527_s1 + $0x4] ss:$8 sps:$4 sm:$0xff]   ;;  %171 = vmatprep.mubr.bf16.mxu0 %v381_v1  ;;  %181 = vmatprep.mubr.bf16.mxu1 %v381_v1  ;;  %v341_v2 = vld [vmem:[%s527_s1] ss:$8 sps:$4 sm:$0xff]   ;;  %v342_v3 = vld [vmem:[%s527_s1 + $0x14] ss:$8 sps:$4 sm:$0xff]  }
   0x2   :  { %139 = vmatprep.subr.bf16.mxu0 %v339_v0  ;;  %322 = vmatprep.subr.bf16.mxu1 %v339_v0  ;;  %v344_v4 = vld [vmem:[%s527_s1 + $0x10] ss:$8 sps:$4 sm:$0xff]   ;;  %v345_v5 = vld [vmem:[%s527_s1 + $0x24] ss:$8 sps:$4 sm:$0xff]   ;;  %v347_v6 = vld [vmem:[%s527_s1 + $0x20] ss:$8 sps:$4 sm:$0xff]  }
   0x3   :  { %140 = vmatpush1.bf16.msra.mxu0 %v341_v2  ;;  %330 = vmatpush1.bf16.msra.mxu1 %v341_v2  ;;  %v348_v7 = vld [vmem:[%s527_s1 + $0x34] ss:$8 sps:$4 sm:$0xff]   ;;  %v350_v8 = vld [vmem:[%s527_s1 + $0x30] ss:$8 sps:$4 sm:$0xff]   ;;  %v351_v9 = vld [vmem:[%s527_s1 + $0x44] ss:$8 sps:$4 sm:$0xff]  }
   0x4   :  { %141 = vmatprep.subr.bf16.mxu0 %v342_v3  ;;  %323 = vmatprep.subr.bf16.mxu1 %v342_v3  ;;  %v353_v10 = vld [vmem:[%s527_s1 + $0x40] ss:$8 sps:$4 sm:$0xff]   ;;  %v354_v11 = vld [vmem:[%s527_s1 + $0x54] ss:$8 sps:$4 sm:$0xff]   ;;  %v356_v12 = vld [vmem:[%s527_s1 + $0x50] ss:$8 sps:$4 sm:$0xff]  }
   0x5   :  { %v357_v13 = vld [vmem:[%s527_s1 + $0x64] ss:$8 sps:$4 sm:$0xff]   ;;  %v359_v14 = vld [vmem:[%s527_s1 + $0x60] ss:$8 sps:$4 sm:$0xff]   ;;  %v360_v15 = vld [vmem:[%s527_s1 + $0x74] ss:$8 sps:$4 sm:$0xff]  }
   0x6   :  { %v362_v16 = vld [vmem:[%s527_s1 + $0x70] ss:$8 sps:$4 sm:$0xff]   ;;  %v363_v17 = vld [vmem:[%s528_s0] sm:$0xff]   ;;  %v364_v18 = vld [vmem:[%s528_s0 + $0x8] sm:$0xff]   ;;  %v38_v20 = vshrl.u32 %v37_v19, 7 }
   0x7   :  { %142 = vmatpush1.bf16.msra.mxu0 %v344_v4  ;;  %331 = vmatpush1.bf16.msra.mxu1 %v344_v4  ;;  %v35_v22 = vld [vmem:[%s529_s2] sm:$0x3] }
   0x8   :  { %143 = vmatprep.subr.bf16.mxu0 %v345_v5  ;;  %324 = vmatprep.subr.bf16.mxu1 %v345_v5  ;;  %v39_v21 = vsub.s32 0, %v38_v20  ;;  %v43_v23 = vsub.s32 1, %v38_v20 }
   0xa   :  { %v40_v24 = vrot.slane %v35_v22, %v39_v21  ;;  %v44_v25 = vrot.slane %v35_v22, %v43_v23 }
   0xb   :  { %144 = vmatpush1.bf16.msra.mxu0 %v347_v6  ;;  %332 = vmatpush1.bf16.msra.mxu1 %v347_v6 }
   0xc   :  { %145 = vmatprep.subr.bf16.mxu0 %v348_v7  ;;  %325 = vmatprep.subr.bf16.mxu1 %v348_v7 }
   0xf   :  { %146 = vmatpush1.bf16.msra.mxu0 %v350_v8  ;;  %333 = vmatpush1.bf16.msra.mxu1 %v350_v8 }
  0x10   :  { %147 = vmatprep.subr.bf16.mxu0 %v351_v9  ;;  %326 = vmatprep.subr.bf16.mxu1 %v351_v9 }
  0x13   :  { %148 = vmatpush1.bf16.msra.mxu0 %v353_v10  ;;  %334 = vmatpush1.bf16.msra.mxu1 %v353_v10 }
  0x14   :  { %149 = vmatprep.subr.bf16.mxu0 %v354_v11  ;;  %327 = vmatprep.subr.bf16.mxu1 %v354_v11 }
  0x17   :  { %150 = vmatpush1.bf16.msra.mxu0 %v356_v12  ;;  %335 = vmatpush1.bf16.msra.mxu1 %v356_v12 }
  0x18   :  { %151 = vmatprep.subr.bf16.mxu0 %v357_v13  ;;  %328 = vmatprep.subr.bf16.mxu1 %v357_v13 }
  0x1b   :  { %152 = vmatpush1.bf16.msra.mxu0 %v359_v14  ;;  %336 = vmatpush1.bf16.msra.mxu1 %v359_v14 }
  0x1c   :  { %153 = vmatprep.subr.bf16.mxu0 %v360_v15  ;;  %329 = vmatprep.subr.bf16.mxu1 %v360_v15 }
  0x1f   :  { %154 = vmatpush1.bf16.msra.mxu0 %v362_v16  ;;  %337 = vmatpush1.bf16.msra.mxu1 %v362_v16 }
  0x22   :  { %172 = vmatmul.mubr.bf16.vlgmr.msra.gmra.mrb[0].mxu0 %v363_v17  ;;  %182 = vmatmul.mubr.bf16.vlgmr.msra.gmra.mrb[0].mxu1 %v364_v18 }
  0xf5   :  { %v173_v26 = vpop.f32.mrb[0].mxu0  ;;  %v183_v27 = vpop.f32.mrb[0].mxu1 }
  0xf6   :  { %v459_v28 = vadd.f32 %v173_v26, %v40_v24  ;;  %v461_v29 = vadd.f32 %v183_v27, %v40_v24  ;;  %v175_v30 = vpop.f32.mrb[1].mxu0  ;;  %v185_v31 = vpop.f32.mrb[1].mxu1 }
  0xf7   :  { %v463_v32 = vadd.f32 %v175_v30, %v44_v25  ;;  %v465_v33 = vadd.f32 %v185_v31, %v44_v25  ;;  %v177_v34 = vpop.f32.mrb[2].mxu0  ;;  %v187_v35 = vpop.f32.mrb[2].mxu1 }
  0xf8   :  { %v192_v36 = vmul.f32 %v459_v28, %v459_v28  ;;  %v196_v37 = vmul.f32 %v461_v29, %v461_v29  ;;  %v471_v38 = vadd.f32 %v177_v34, %v40_v24  ;;  %v473_v39 = vadd.f32 %v187_v35, %v40_v24  ;;  %v179_v40 = vpop.f32.mrb[3].mxu0  ;;  %v189_v41 = vpop.f32.mrb[3].mxu1 }
  0xf9   :  { %v193_v42 = vmul.f32 %v463_v32, %v463_v32  ;;  %v197_v43 = vmul.f32 %v465_v33, %v465_v33  ;;  %v479_v44 = vadd.f32 %v179_v40, %v44_v25  ;;  %v481_v45 = vadd.f32 %v189_v41, %v44_v25 }
  0xfa   :  { %v200_v46 = vmul.f32 %v192_v36, %v459_v28  ;;  %v204_v47 = vmul.f32 %v196_v37, %v461_v29  ;;  %v194_v48 = vmul.f32 %v471_v38, %v471_v38  ;;  %v198_v49 = vmul.f32 %v473_v39, %v473_v39 }
  0xfb   :  { %v201_v50 = vmul.f32 %v193_v42, %v463_v32  ;;  %v205_v51 = vmul.f32 %v197_v43, %v465_v33  ;;  %v195_v52 = vmul.f32 %v479_v44, %v479_v44  ;;  %v199_v53 = vmul.f32 %v481_v45, %v481_v45 }
  0xfc   :  { %v208_v54 = vmul.f32 0.044715, %v200_v46  ;;  %v212_v55 = vmul.f32 0.044715, %v204_v47  ;;  %v202_v56 = vmul.f32 %v194_v48, %v471_v38  ;;  %v206_v57 = vmul.f32 %v198_v49, %v473_v39 }
  0xfd   :  { %v209_v58 = vmul.f32 0.044715, %v201_v50  ;;  %v213_v59 = vmul.f32 0.044715, %v205_v51  ;;  %v203_v60 = vmul.f32 %v195_v52, %v479_v44  ;;  %v207_v61 = vmul.f32 %v199_v53, %v481_v45 }
  0xfe   :  { %v216_v62 = vadd.f32 %v208_v54, %v459_v28  ;;  %v220_v63 = vadd.f32 %v212_v55, %v461_v29  ;;  %v210_v0 = vmul.f32 0.044715, %v202_v56  ;;  %v214_v1 = vmul.f32 0.044715, %v206_v57 }
  0xff   :  { %v217_v2 = vadd.f32 %v209_v58, %v463_v32  ;;  %v221_v3 = vadd.f32 %v213_v59, %v465_v33  ;;  %v211_v4 = vmul.f32 0.044715, %v203_v60  ;;  %v215_v5 = vmul.f32 0.044715, %v207_v61 }
 0x100   :  { %v224_v6 = vmul.f32 0.7978846, %v216_v62  ;;  %v228_v7 = vmul.f32 0.7978846, %v220_v63  ;;  %v218_v8 = vadd.f32 %v210_v0, %v471_v38  ;;  %v222_v9 = vadd.f32 %v214_v1, %v473_v39 }
 0x101   :  { %v225_v10 = vmul.f32 0.7978846, %v217_v2  ;;  %v229_v11 = vmul.f32 0.7978846, %v221_v3  ;;  %v219_v12 = vadd.f32 %v211_v4, %v479_v44  ;;  %v223_v13 = vadd.f32 %v215_v5, %v481_v45 }
 0x102   :  { %365 = vtanh.f32 %v224_v6  ;;  %v226_v14 = vmul.f32 0.7978846, %v218_v8  ;;  %v230_v15 = vmul.f32 0.7978846, %v222_v9 }
 0x103   :  { %367 = vtanh.f32 %v228_v7  ;;  %v227_v16 = vmul.f32 0.7978846, %v219_v12  ;;  %v231_v17 = vmul.f32 0.7978846, %v223_v13 }
 0x104   :  { %369 = vtanh.f32 %v225_v10 }
 0x105   :  { %371 = vtanh.f32 %v229_v11 }
 0x106   :  { %373 = vtanh.f32 %v226_v14 }
 0x107   :  { %375 = vtanh.f32 %v230_v15 }
 0x108   :  { %377 = vtanh.f32 %v227_v16 }
 0x109   :  { %379 = vtanh.f32 %v231_v17 }
 0x10c   :  { %v366_v18 = vpop.eup %365 }
 0x10d   :  { %v368_v19 = vpop.eup %367  ;;  %v240_v20 = vadd.f32 1.0, %v366_v18 }
 0x10e   :  { %v370_v21 = vpop.eup %369  ;;  %v244_v22 = vadd.f32 1.0, %v368_v19 }
 0x10f   :  { %v372_v23 = vpop.eup %371  ;;  %v248_v24 = vmul.f32 0.5, %v240_v20  ;;  %v241_v25 = vadd.f32 1.0, %v370_v21 }
 0x110   :  { %v374_v26 = vpop.eup %373  ;;  %v252_v27 = vmul.f32 0.5, %v244_v22  ;;  %v245_v30 = vadd.f32 1.0, %v372_v23 }
 0x111   :  { %v376_v31 = vpop.eup %375  ;;  %v256_v34 = vmul.f32 %v248_v24, %v459_v28  ;;  %v249_v35 = vmul.f32 0.5, %v241_v25  ;;  %v242_v36 = vadd.f32 1.0, %v374_v26 }
 0x112   :  { %v378_v37 = vpop.eup %377  ;;  %v260_v40 = vmul.f32 %v252_v27, %v461_v29  ;;  %v253_v41 = vmul.f32 0.5, %v245_v30  ;;  %v246_v42 = vadd.f32 1.0, %v376_v31 }
 0x113   :  { %v380_v43 = vpop.eup %379  ;;  %v257_v46 = vmul.f32 %v249_v35, %v463_v32  ;;  %v250_v47 = vmul.f32 0.5, %v242_v36  ;;  %v243_v48 = vadd.f32 1.0, %v378_v37 }
 0x114   :  { %v261_v49 = vmul.f32 %v253_v41, %v465_v33  ;;  %v254_v50 = vmul.f32 0.5, %v246_v42  ;;  %v247_v51 = vadd.f32 1.0, %v380_v43 }
 0x115   :  { %v318_v52 = vpack.c.bf16 %v257_v46, %v256_v34  ;;  %v258_v53 = vmul.f32 %v250_v47, %v471_v38  ;;  %v251_v28 = vmul.f32 0.5, %v243_v48 }
 0x116   :  { %v320_v54 = vpack.c.bf16 %v261_v49, %v260_v40  ;;  %v262_v55 = vmul.f32 %v254_v50, %v473_v39  ;;  %v255_v56 = vmul.f32 0.5, %v247_v51 }
 0x117   :  { %288 = vst [vmem:[%s530_s3] sm:$0xff] %v318_v52  ;;  %v259_v29 = vmul.f32 %v251_v28, %v479_v44 }
 0x118   :  { %290 = vst [vmem:[%s530_s3 + $0x10] sm:$0xff] %v320_v54  ;;  %v263_v32 = vmul.f32 %v255_v56, %v481_v45 }
 0x119   :  { %v319_v33 = vpack.c.bf16 %v259_v29, %v258_v53 }
 0x11a   :  { %v321_v57 = vpack.c.bf16 %v263_v32, %v262_v55 }
 0x11b   :  { %289 = vst [vmem:[%s530_s3 + $0x8] sm:$0xff] %v319_v33 }
 0x11c   :  { %291 = vst [vmem:[%s530_s3 + $0x18] sm:$0xff] %v321_v57 }

// kernel: bert_classifier_forward.23
= control target key start
LH: loop header
LB: loop body
LE: loop exit
PB: predicated region body
PF: predicated region fallthrough
CT: control target
= control target key end

     0   :  { %v409_v3 = vmov 0.0|0.0   ;;  %vm410_vm0 = vmmov 0   ;;  %v411_v6 = vmov 0.0   ;;  %s576_s0 = inlined_call_operand.vmem [shape: f32[2,128], index: 0, kind: input, shape index: {}]   ;;  %s577_s1 = inlined_call_operand.vmem [shape: f32[128,128], index: 1, kind: input, shape index: {}]   ;;  %s578_s2 = inlined_call_operand.vmem [shape: f32[1,128], index: 2, kind: input, shape index: {}]   ;;  %s579_s3 = inlined_call_operand.vmem [shape: f32[128,128], index: 3, kind: input, shape index: {}]   ;;  %s580_s4 = inlined_call_operand.vmem [shape: f32[1,128], index: 4, kind: input, shape index: {}]   ;;  %s581_s5 = inlined_call_operand.hbm [shape: f32[2,128], index: 5, kind: output, shape index: {}]  }
   0x1   :  { %v22_v0 = vld [vmem:[%s577_s1] sm:$0xff]  ;;  %v23_v1 = vld [vmem:[%s577_s1 + $0x8] sm:$0xff]  ;;  %v24_v2 = vld [vmem:[%s577_s1 + $0x10] sm:$0xff]  ;;  %331 = vmatprep.subr.bf16.mxu0 %v409_v3  ;;  %293 = vmatprep.mubr.msk.f32.mxu0 %vm410_vm0, %v411_v6 }
   0x2   :  { %v332_v4 = vpack.c.bf16 %v23_v1, %v22_v0  ;;  %v25_v5 = vld [vmem:[%s577_s1 + $0x18] sm:$0xff]  ;;  %355 = vmatprep.subr.bf16.mxu1 %v409_v3  ;;  %328 = vmatprep.mubr.msk.f32.mxu1 %vm410_vm0, %v411_v6  ;;  %v26_v8 = vld [vmem:[%s577_s1 + $0x20] sm:$0xff]  ;;  %v27_v9 = vld [vmem:[%s577_s1 + $0x28] sm:$0xff] }
   0x3   :  { %v335_v7 = vpack.c.bf16 %v25_v5, %v24_v2  ;;  %v116_v10 = vld [vmem:[%s579_s3] sm:$0xff]  ;;  %v117_v11 = vld [vmem:[%s579_s3 + $0x8] sm:$0xff]  ;;  %v118_v12 = vld [vmem:[%s579_s3 + $0x10] sm:$0xff]  ;;  %v338_v14 = vpack.c.bf16 %v27_v9, %v26_v8 }
   0x4   :  { %333 = vmatpush3.bf16.msra.mxu0 %v332_v4  ;;  %v119_v13 = vld [vmem:[%s579_s3 + $0x18] sm:$0xff]  ;;  %v356_v15 = vpack.c.bf16 %v117_v11, %v116_v10  ;;  %v28_v16 = vld [vmem:[%s577_s1 + $0x30] sm:$0xff] }
   0x5   :  { %334 = vmatprep.subr.bf16.mxu0 %v409_v3  ;;  %v29_v17 = vld [vmem:[%s577_s1 + $0x38] sm:$0xff]  ;;  %v359_v18 = vpack.c.bf16 %v119_v13, %v118_v12 }
   0x6   :  { %357 = vmatpush3.bf16.msra.mxu1 %v356_v15 }
   0x8   :  { %336 = vmatpush3.bf16.msra.mxu0 %v335_v7 }
   0x9   :  { %337 = vmatprep.subr.bf16.mxu0 %v409_v3 }
   0xa   :  { %10 = vsyncpa [#allocation3], 0  ;;  %358 = vmatprep.subr.bf16.mxu1 %v409_v3  ;;  %v120_v19 = vld [vmem:[%s579_s3 + $0x20] sm:$0xff]  ;;  %v121_v20 = vld [vmem:[%s579_s3 + $0x28] sm:$0xff]  ;;  %v341_v21 = vpack.c.bf16 %v29_v17, %v28_v16 }
   0xb   :  { %v30_v22 = vld [vmem:[%s577_s1 + $0x40] sm:$0xff]  ;;  %v31_v23 = vld [vmem:[%s577_s1 + $0x48] sm:$0xff]  ;;  %360 = vmatpush3.bf16.msra.mxu1 %v359_v18  ;;  %v362_v24 = vpack.c.bf16 %v121_v20, %v120_v19  ;;  %v122_v25 = vld [vmem:[%s579_s3 + $0x30] sm:$0xff] }
   0xc   :  { %339 = vmatpush3.bf16.msra.mxu0 %v338_v14  ;;  %361 = vmatprep.subr.bf16.mxu1 %v409_v3  ;;  %v123_v26 = vld [vmem:[%s579_s3 + $0x38] sm:$0xff]  ;;  %v344_v27 = vpack.c.bf16 %v31_v23, %v30_v22  ;;  %v32_v28 = vld [vmem:[%s577_s1 + $0x50] sm:$0xff]  ;;  %v124_v31 = vld [vmem:[%s579_s3 + $0x40] sm:$0xff] }
   0xd   :  { %340 = vmatprep.subr.bf16.mxu0 %v409_v3  ;;  %v33_v29 = vld [vmem:[%s577_s1 + $0x58] sm:$0xff]  ;;  %v365_v30 = vpack.c.bf16 %v123_v26, %v122_v25  ;;  %v125_v32 = vld [vmem:[%s579_s3 + $0x48] sm:$0xff]  ;;  %v34_v34 = vld [vmem:[%s577_s1 + $0x60] sm:$0xff] }
   0xe   :  { %v347_v33 = vpack.c.bf16 %v33_v29, %v32_v28  ;;  %v35_v35 = vld [vmem:[%s577_s1 + $0x68] sm:$0xff]  ;;  %v368_v36 = vpack.c.bf16 %v125_v32, %v124_v31  ;;  %v36_v38 = vld [vmem:[%s577_s1 + $0x70] sm:$0xff]  ;;  %v37_v39 = vld [vmem:[%s577_s1 + $0x78] sm:$0xff] }
   0xf   :  { %363 = vmatpush3.bf16.msra.mxu1 %v362_v24  ;;  %v350_v37 = vpack.c.bf16 %v35_v35, %v34_v34  ;;  %v353_v40 = vpack.c.bf16 %v37_v39, %v36_v38  ;;  %v21_v41 = vld [vmem:[%s576_s0] sm:$0x3]  ;;  %v126_v42 = vld [vmem:[%s579_s3 + $0x50] sm:$0xff]  ;;  %v127_v43 = vld [vmem:[%s579_s3 + $0x58] sm:$0xff] }
  0x10   :  { %342 = vmatpush3.bf16.msra.mxu0 %v341_v21  ;;  %364 = vmatprep.subr.bf16.mxu1 %v409_v3  ;;  %v371_v44 = vpack.c.bf16 %v127_v43, %v126_v42  ;;  %v128_v45 = vld [vmem:[%s579_s3 + $0x60] sm:$0xff]  ;;  %v129_v46 = vld [vmem:[%s579_s3 + $0x68] sm:$0xff]  ;;  %v130_v48 = vld [vmem:[%s579_s3 + $0x70] sm:$0xff] }
  0x11   :  { %343 = vmatprep.subr.bf16.mxu0 %v409_v3  ;;  %v374_v47 = vpack.c.bf16 %v129_v46, %v128_v45  ;;  %v131_v49 = vld [vmem:[%s579_s3 + $0x78] sm:$0xff]  ;;  %v225_v51 = vld [vmem:[%s578_s2] ss:$0 sm:$0xff]  ;;  %s412_s3 = smov [#allocation2]  }
  0x12   :  { %v377_v50 = vpack.c.bf16 %v131_v49, %v130_v48  ;;  %v226_v56 = vld [vmem:[%s580_s4] ss:$0 sm:$0xff]  ;;  %s217_s11 = sshll.u32 %s412_s3, 4  ;;  %s218_s11 = int_to_ptr.vmem [resolvable:$true] %s217_s11 }
  0x13   :  { %366 = vmatpush3.bf16.msra.mxu1 %v365_v30  ;;  %s385_s12 = scalar_lea.vmem %s218_s11, 32  ;;  %p390_p1 = scmp.lt.s32.totalorder %s218_s11, %s218_s11 }
  0x14   :  { %345 = vmatpush3.bf16.msra.mxu0 %v344_v27  ;;  %367 = vmatprep.subr.bf16.mxu1 %v409_v3  ;;  %p386_p0 = scmp.ne.s32.totalorder %s218_s11, %s385_s12  ;;  %p391_p2 = scmp.lt.s32.totalorder %s385_s12, %s385_s12 }
  0x15   :  { %346 = vmatprep.subr.bf16.mxu0 %v409_v3 }
  0x16   :  { %p392_p3 = por %p391_p2, %p390_p1 }
  0x17   :  { %369 = vmatpush3.bf16.msra.mxu1 %v368_v36 }
  0x18   :  { %348 = vmatpush3.bf16.msra.mxu0 %v347_v33  ;;  %370 = vmatprep.subr.bf16.mxu1 %v409_v3  ;;  %p393_p4 = pnand %p392_p3, %p386_p0 }
  0x19   :  { %349 = vmatprep.subr.bf16.mxu0 %v409_v3 }
  0x1b   :  { %372 = vmatpush3.bf16.msra.mxu1 %v371_v44 }
  0x1c   :  { %351 = vmatpush3.bf16.msra.mxu0 %v350_v37  ;;  %373 = vmatprep.subr.bf16.mxu1 %v409_v3 }
  0x1d   :  { %352 = vmatprep.subr.bf16.mxu0 %v409_v3 }
  0x1f   :  { %375 = vmatpush3.bf16.msra.mxu1 %v374_v47 }
  0x20   :  { %354 = vmatpush3.bf16.msra.mxu0 %v353_v40  ;;  %376 = vmatprep.subr.bf16.mxu1 %v409_v3 }
  0x23   :  { %294 = vmatmul.mubr.f32.vlgmr.msra.gmra.mrb[0].mxu0 %v21_v41  ;;  %378 = vmatpush3.bf16.msra.mxu1 %v377_v50 }
  0xf6   :  { %v111_v52 = vpop.f32.mrb[0].mxu0 }
  0xf7   :  { %v112_v53 = vadd.f32 %v225_v51, %v111_v52  ;;  %v295_v54 = vpop.f32.mrb[1].mxu0 }
  0xf9   :  { %383 = vtanh.f32 %v112_v53 }
 0x103   :  { %v384_v55 = vpop.eup %383 }
 0x104   :  { %329 = vmatmul.mubr.f32.vlgmr.msra.gmra.mrb[0].mxu1 %v384_v55 }
 0x1d7   :  { %v205_v57 = vpop.f32.mrb[0].mxu1 }
 0x1d8   :  { %v206_v58 = vadd.f32 %v226_v56, %v205_v57  ;;  %v330_v59 = vpop.f32.mrb[1].mxu1 }
 0x1da   :  { %v209_v60 = vmax.f32 %v206_v58, 0.0 }
 0x1dc   :  { %210 = vst [vmem:[#allocation2] sm:$0x3] %v209_v60 }
 0x1dd   :  { %396 = shalt.err (!%p393_p4)
}
 0x1de   :  { %s397_s14 = scalar_lea.hbm %s581_s5, 32 }
 0x1df   :  { %p398_p5 = scmp.ne.s32.totalorder %s581_s5, %s397_s14  ;;  %p401_p6 = scmp.lt.u32.totalorder %s397_s14, %s581_s5 }
 0x1e1   :  { %p403_p7 = pnand %p401_p6, %p398_p5 }
 0x1e3   :  { %406 = shalt.err (!%p403_p7)
}
 0x1e4   :  { %220 = dma.vmem_to_hbm [thread:$0]  %s218_s11, 32, %s581_s5, [#allocation3]  }
 0x1e5   :  { %407 = dma.done.wait [#allocation3], 32  }
 0x1e6   :  { %408 = vsyncadd [#allocation3], 4294967264 }
 0x1e7   :  { %224 = vsyncpa [#allocation3], 1 }

// kernel: bert_classifier_forward.17
= control target key start
LH: loop header
LB: loop body
LE: loop exit
PB: predicated region body
PF: predicated region fallthrough
CT: control target
= control target key end

     0   :  { %s576_s1 = inlined_call_operand.vmem [shape: bf16[256,128], index: 1, kind: input, shape index: {}]   ;;  %s577_s0 = inlined_call_operand.vmem [shape: bf16[32,256], index: 0, kind: input, shape index: {}]   ;;  %s578_s3 = inlined_call_operand.vmem [shape: bf16[32,128], index: 3, kind: input, shape index: {}]   ;;  %s579_s2 = inlined_call_operand.vmem [shape: f32[1,128], index: 2, kind: input, shape index: {}]   ;;  %s580_s4 = inlined_call_operand.vmem [shape: f32[1,128], index: 4, kind: input, shape index: {}]   ;;  %s581_s5 = inlined_call_operand.vmem [shape: f32[1,128], index: 5, kind: input, shape index: {}]   ;;  %s582_s6 = inlined_call_operand.vmem [shape: bf16[32,128], index: 6, kind: output, shape index: {}]  }
   0x1   :  { %v430_v0 = vld [vmem:[%s576_s1 + $0x40] sm:$0xff]   ;;  %v432_v2 = vld [vmem:[%s576_s1 + $0x48] sm:$0xff]   ;;  %v434_v4 = vld [vmem:[%s576_s1 + $0x50] sm:$0xff]  }
   0x2   :  { %v431_v1 = vld [vmem:[%s576_s1] sm:$0xff]   ;;  %386 = vmatprep.subr.bf16.mxu0 %v430_v0  ;;  %414 = vmatprep.subr.bf16.mxu1 %v430_v0  ;;  %v433_v3 = vld [vmem:[%s576_s1 + $0x8] sm:$0xff]   ;;  %v435_v5 = vld [vmem:[%s576_s1 + $0x10] sm:$0xff]  }
   0x3   :  { %387 = vmatpush3.bf16.msra.mxu0 %v431_v1  ;;  %422 = vmatpush3.bf16.msra.mxu1 %v431_v1  ;;  %v436_v6 = vld [vmem:[%s576_s1 + $0x58] sm:$0xff]   ;;  %v438_v8 = vld [vmem:[%s576_s1 + $0x60] sm:$0xff]   ;;  %v440_v10 = vld [vmem:[%s576_s1 + $0x68] sm:$0xff]  }
   0x4   :  { %388 = vmatprep.subr.bf16.mxu0 %v432_v2  ;;  %415 = vmatprep.subr.bf16.mxu1 %v432_v2  ;;  %v437_v7 = vld [vmem:[%s576_s1 + $0x18] sm:$0xff]   ;;  %v439_v9 = vld [vmem:[%s576_s1 + $0x20] sm:$0xff]   ;;  %v441_v13 = vld [vmem:[%s576_s1 + $0x28] sm:$0xff]  }
   0x5   :  { %v448_v11 = vld [vmem:[%s577_s0 + $0x4] ss:$8 sps:$4 sm:$0xff]   ;;  %v451_v12 = vld [vmem:[%s577_s0 + $0x14] ss:$8 sps:$4 sm:$0xff]   ;;  %v446_v18 = vld [vmem:[%s577_s0] ss:$8 sps:$4 sm:$0xff]  }
   0x6   :  { %v442_v14 = vld [vmem:[%s576_s1 + $0x70] sm:$0xff]   ;;  %215 = vmatprep.mubr.bf16.mxu0 %v448_v11  ;;  %223 = vmatprep.mubr.bf16.mxu1 %v451_v12  ;;  %v444_v16 = vld [vmem:[%s576_s1 + $0x78] sm:$0xff]   ;;  %v384_v20 = vld [vmem:[%s578_s3 + $0x8] sm:$0xff]  }
   0x7   :  { %389 = vmatpush3.bf16.msra.mxu0 %v433_v3  ;;  %423 = vmatpush3.bf16.msra.mxu1 %v433_v3  ;;  %v443_v15 = vld [vmem:[%s576_s1 + $0x30] sm:$0xff]   ;;  %v445_v17 = vld [vmem:[%s576_s1 + $0x38] sm:$0xff]   ;;  %v367_v21 = vld [vmem:[%s578_s3] sm:$0xff]   ;;  %v372_v31 = vunpack.c.l.bf16 %v384_v20  ;;  %v373_v35 = vunpack.c.h.bf16 %v384_v20 }
   0x8   :  { %390 = vmatprep.subr.bf16.mxu0 %v434_v4  ;;  %416 = vmatprep.subr.bf16.mxu1 %v434_v4  ;;  %v449_v19 = vld [vmem:[%s577_s0 + $0x10] ss:$8 sps:$4 sm:$0xff]   ;;  %v335_v24 = vld [vmem:[%s579_s2] ss:$0 sm:$0xff]  ;;  %v368_v32 = vunpack.c.l.bf16 %v367_v21  ;;  %v369_v40 = vunpack.c.h.bf16 %v367_v21 }
   0xb   :  { %391 = vmatpush3.bf16.msra.mxu0 %v435_v5  ;;  %424 = vmatpush3.bf16.msra.mxu1 %v435_v5 }
   0xc   :  { %392 = vmatprep.subr.bf16.mxu0 %v436_v6  ;;  %417 = vmatprep.subr.bf16.mxu1 %v436_v6 }
   0xf   :  { %393 = vmatpush3.bf16.msra.mxu0 %v437_v7  ;;  %425 = vmatpush3.bf16.msra.mxu1 %v437_v7 }
  0x10   :  { %394 = vmatprep.subr.bf16.mxu0 %v438_v8  ;;  %418 = vmatprep.subr.bf16.mxu1 %v438_v8 }
  0x13   :  { %395 = vmatpush3.bf16.msra.mxu0 %v439_v9  ;;  %426 = vmatpush3.bf16.msra.mxu1 %v439_v9 }
  0x14   :  { %396 = vmatprep.subr.bf16.mxu0 %v440_v10  ;;  %419 = vmatprep.subr.bf16.mxu1 %v440_v10 }
  0x17   :  { %397 = vmatpush3.bf16.msra.mxu0 %v441_v13  ;;  %427 = vmatpush3.bf16.msra.mxu1 %v441_v13  ;;  %v356_v13 = vld [vmem:[%s580_s4] ss:$0 sm:$0xff] }
  0x18   :  { %398 = vmatprep.subr.bf16.mxu0 %v442_v14  ;;  %420 = vmatprep.subr.bf16.mxu1 %v442_v14 }
  0x1b   :  { %399 = vmatpush3.bf16.msra.mxu0 %v443_v15  ;;  %428 = vmatpush3.bf16.msra.mxu1 %v443_v15 }
  0x1c   :  { %400 = vmatprep.subr.bf16.mxu0 %v444_v16  ;;  %421 = vmatprep.subr.bf16.mxu1 %v444_v16 }
  0x1f   :  { %401 = vmatpush3.bf16.msra.mxu0 %v445_v17  ;;  %429 = vmatpush3.bf16.msra.mxu1 %v445_v17 }
  0x22   :  { %216 = vmatmul.mubr.bf16.vlgmr.msra.gmra.mrb[0].mxu0 %v446_v18  ;;  %224 = vmatmul.mubr.bf16.vlgmr.msra.gmra.mrb[0].mxu1 %v449_v19  ;;  %v357_v18 = vld [vmem:[%s581_s5] ss:$0 sm:$0xff] }
  0xf5   :  { %v402_v22 = vpop.f32.mrb[0].mxu0  ;;  %v408_v23 = vpop.f32.mrb[0].mxu1 }
  0xf6   :  { %v403_v25 = vpop.f32.mrb[1].mxu0  ;;  %v409_v26 = vpop.f32.mrb[1].mxu1 }
  0xf7   :  { %v404_v27 = vadd.f32 %v403_v25, %v402_v22  ;;  %v410_v28 = vadd.f32 %v409_v26, %v408_v23  ;;  %v405_v29 = vpop.f32.mrb[2].mxu0  ;;  %v411_v30 = vpop.f32.mrb[2].mxu1 }
  0xf8   :  { %v406_v33 = vpop.f32.mrb[3].mxu0  ;;  %v412_v34 = vpop.f32.mrb[3].mxu1 }
  0xf9   :  { %v218_v36 = vadd.f32 %v404_v27, %v335_v24  ;;  %v226_v37 = vadd.f32 %v410_v28, %v335_v24  ;;  %v407_v38 = vadd.f32 %v406_v33, %v405_v29  ;;  %v413_v39 = vadd.f32 %v412_v34, %v411_v30 }
  0xfb   :  { %v221_v41 = vadd.f32 %v407_v38, %v335_v24  ;;  %v229_v42 = vadd.f32 %v413_v39, %v335_v24  ;;  %v242_v43 = vadd.f32 %v372_v31, %v226_v37  ;;  %v240_v44 = vadd.f32 %v368_v32, %v218_v36 }
  0xfd   :  { %250 = vadd.xlane.f32.xlu1 %v242_v43  ;;  %246 = vadd.xlane.f32.xlu0 %v240_v44  ;;  %v243_v45 = vadd.f32 %v373_v35, %v229_v42  ;;  %v241_v46 = vadd.f32 %v369_v40, %v221_v41 }
 0x101   :  { %252 = vadd.xlane.f32.xlu1 %v243_v45  ;;  %248 = vadd.xlane.f32.xlu0 %v241_v46 }
 0x18a   :  { %v251_v47 = vpop.xlane.xlu1 %250  ;;  %v247_v48 = vpop.xlane.xlu0 %246 }
 0x18b   :  { %v257_v49 = vmul.f32 0.0078125, %v251_v47  ;;  %v255_v50 = vmul.f32 0.0078125, %v247_v48 }
 0x18d   :  { %v259_v51 = vsub.f32 %v240_v44, %v255_v50  ;;  %v261_v54 = vsub.f32 %v242_v43, %v257_v49 }
 0x18e   :  { %v253_v52 = vpop.xlane.xlu1 %252  ;;  %v249_v53 = vpop.xlane.xlu0 %248 }
 0x18f   :  { %v258_v55 = vmul.f32 0.0078125, %v253_v52  ;;  %v256_v56 = vmul.f32 0.0078125, %v249_v53  ;;  %v263_v57 = vmul.f32 %v259_v51, %v259_v51  ;;  %v265_v60 = vmul.f32 %v261_v54, %v261_v54 }
 0x191   :  { %v260_v58 = vsub.f32 %v241_v46, %v256_v56  ;;  %267 = vadd.xlane.f32.xlu0 %v263_v57  ;;  %v262_v59 = vsub.f32 %v243_v45, %v258_v55 }
 0x193   :  { %v264_v61 = vmul.f32 %v260_v58, %v260_v58  ;;  %v266_v62 = vmul.f32 %v262_v59, %v262_v59 }
 0x195   :  { %271 = vadd.xlane.f32.xlu0 %v265_v60  ;;  %269 = vadd.xlane.f32.xlu1 %v264_v61 }
 0x199   :  { %273 = vadd.xlane.f32.xlu1 %v266_v62 }
 0x21e   :  { %v268_v63 = vpop.xlane.xlu0 %267 }
 0x21f   :  { %v275_v0 = vmul.f32 0.0078125, %v268_v63 }
 0x221   :  { %v279_v1 = vadd.f32 1e-12, %v275_v0 }
 0x222   :  { %v270_v2 = vpop.xlane.xlu1 %269  ;;  %v272_v3 = vpop.xlane.xlu0 %271 }
 0x223   :  { %452 = vrsqrt.f32 %v279_v1  ;;  %v276_v4 = vmul.f32 0.0078125, %v270_v2  ;;  %v277_v5 = vmul.f32 0.0078125, %v272_v3 }
 0x225   :  { %v280_v6 = vadd.f32 1e-12, %v276_v4  ;;  %v281_v7 = vadd.f32 1e-12, %v277_v5 }
 0x226   :  { %v274_v8 = vpop.xlane.xlu1 %273 }
 0x227   :  { %454 = vrsqrt.f32 %v280_v6  ;;  %v278_v9 = vmul.f32 0.0078125, %v274_v8 }
 0x228   :  { %456 = vrsqrt.f32 %v281_v7 }
 0x229   :  { %v282_v10 = vadd.f32 1e-12, %v278_v9 }
 0x22b   :  { %458 = vrsqrt.f32 %v282_v10 }
 0x22d   :  { %v453_v11 = vpop.eup %452 }
 0x22e   :  { %v287_v12 = vmul.f32 %v453_v11, %v259_v51 }
 0x230   :  { %v297_v16 = vmul.f32 %v356_v13, %v287_v12 }
 0x231   :  { %v455_v14 = vpop.eup %454 }
 0x232   :  { %v457_v15 = vpop.eup %456  ;;  %v288_v17 = vmul.f32 %v455_v14, %v260_v58  ;;  %v307_v22 = vadd.f32 %v357_v18, %v297_v16 }
 0x233   :  { %v289_v19 = vmul.f32 %v457_v15, %v261_v54 }
 0x234   :  { %v298_v20 = vmul.f32 %v356_v13, %v288_v17 }
 0x235   :  { %v459_v21 = vpop.eup %458  ;;  %v299_v24 = vmul.f32 %v356_v13, %v289_v19 }
 0x236   :  { %v308_v23 = vadd.f32 %v357_v18, %v298_v20  ;;  %v290_v25 = vmul.f32 %v459_v21, %v262_v59 }
 0x237   :  { %v309_v28 = vadd.f32 %v357_v18, %v299_v24 }
 0x238   :  { %v377_v26 = vpack.c.bf16 %v308_v23, %v307_v22  ;;  %v300_v27 = vmul.f32 %v356_v13, %v290_v25 }
 0x23a   :  { %378 = vst [vmem:[%s582_s6] sm:$0xff] %v377_v26   ;;  %v310_v29 = vadd.f32 %v357_v18, %v300_v27 }
 0x23c   :  { %v382_v30 = vpack.c.bf16 %v310_v29, %v309_v28 }
 0x23e   :  { %385 = vst [vmem:[%s582_s6 + $0x8] sm:$0xff] %v382_v30  }

</bundles_post_ra>
